<compile_context>
chip_gen: v7x
topology: tpu7x:2x2x1
jax: 0.10.0
libtpu: 0.0.40
codegen_flags: <defaults>
</compile_context>

<pallas_src>
import functools

import jax
import jax.numpy as jnp
from jax.experimental import pallas as pl
from jax.experimental.pallas import tpu as pltpu

_LANE = 128


def _round_up(x, m):
    return (x + m - 1) // m * m


def _pick_batch_tile(n, target=512):
    """Largest power-of-two-ish tile <= target that still yields >= 2 grid
    steps (so both v7x TensorCores get work); always a multiple of 8."""
    tile = max(_round_up(min(target, _round_up(n, 8)), 8), 8)
    while tile > 8 and _round_up(n, tile) // tile < 2:
        tile //= 2
    return max(_round_up(tile, 8), 8)


def _vmem_capacity_bytes():
    try:
        cap = getattr(pltpu.get_tpu_info(), "vmem_capacity_bytes", None)
        if cap:
            return int(cap)
    except Exception:
        pass
    return 64 << 20  # conservative: v7x per-TensorCore VMEM


def _ae_kernel(x_ref,
               w1, b1, w2, b2, w3, b3, wz, bz,
               w4, b4, w5, b5, w6, b6, wx, bx,
               xbar_ref, z_ref, *, compute_dtype, xbar_cols):
    """Fused AE forward for one batch tile; weights stay resident in VMEM."""

    def linear(h, w_ref, b_ref, relu):
        y = jnp.dot(h.astype(compute_dtype), w_ref[...],
                    preferred_element_type=jnp.float32)
        y = y + b_ref[...]              # (1, out) f32 bias broadcasts over rows
        if relu:
            # cast at production: inter-layer activations live in VMEM at
            # compute_dtype (halves the working set for the 2000-wide layers)
            y = jnp.maximum(y, 0.0).astype(compute_dtype)
        return y

    x = x_ref[...]                      # already compute_dtype (host-cast)

    # encoder
    h = linear(x, w1, b1, relu=True)        # enc_1 + ReLU
    h = linear(h, w2, b2, relu=True)        # enc_2 + ReLU
    h = linear(h, w3, b3, relu=True)        # enc_3 + ReLU
    z = linear(h, wz, bz, relu=False)       # z_layer (no activation, f32)

    # decoder
    h = linear(z, w4, b4, relu=True)        # dec_1 + ReLU
    h = linear(h, w5, b5, relu=True)        # dec_2 + ReLU
    h = linear(h, w6, b6, relu=True)        # dec_3 + ReLU
    x_bar = linear(h, wx, bx, relu=False)   # x_bar_layer (no activation, f32)

    z_ref[...] = z.astype(z_ref.dtype)
    # x_bar output has its true (unpadded) column count -> drop padded lanes
    # with a static slice; avoids a post-kernel HBM round trip.
    xbar_ref[...] = x_bar[:, :xbar_cols].astype(xbar_ref.dtype)


def ae_forward(x, params, *, batch_tile=None, compute_dtype=jnp.bfloat16,
               out_dtype=None, vmem_limit_bytes=None):
    """params: list of 8 (W, b) with W shaped (in, out) (transpose of torch
    Linear.weight) and b shaped (out,). Returns (x_bar, z)."""
    n, n_input = x.shape
    n_z = params[3][0].shape[1]
    out_dtype = x.dtype if out_dtype is None else out_dtype

    if batch_tile is None:
        batch_tile = _pick_batch_tile(n)

    # ---- pad batch to a multiple of the tile and every feature dim to a
    #      multiple of 128 lanes (exact: padded weights/biases are zero). ----
    n_pad = _round_up(n, batch_tile)
    dims_in = [w.shape[0] for w, _ in params]
    dims_out = [w.shape[1] for w, _ in params]
    dims_in_p = [_round_up(d, _LANE) for d in dims_in]
    dims_out_p = [_round_up(d, _LANE) for d in dims_out]

    c_itemsize = jnp.dtype(compute_dtype).itemsize
    o_itemsize = jnp.dtype(out_dtype).itemsize

    # host-side cast to compute dtype (halves the input DMA in the bf16 path)
    x_p = jnp.pad(x.astype(compute_dtype),
                  ((0, n_pad - n), (0, dims_in_p[0] - n_input)))

    flat_params = []
    param_specs = []
    for (w, b), di, do in zip(params, dims_in_p, dims_out_p):
        w_p = jnp.pad(w.astype(compute_dtype),
                      ((0, di - w.shape[0]), (0, do - w.shape[1])))
        b_p = jnp.pad(b.astype(jnp.float32), (0, do - b.shape[0])).reshape(1, do)
        flat_params.extend([w_p, b_p])
        # Untiled, single-buffered VMEM residents (grid-invariant, so no
        # double-buffering is wanted).
        param_specs.append(pl.BlockSpec(memory_space=pltpu.MemorySpace.VMEM))
        param_specs.append(pl.BlockSpec(memory_space=pltpu.MemorySpace.VMEM))

    x_spec = pl.BlockSpec((batch_tile, dims_in_p[0]), lambda i: (i, 0))
    out_specs = (
        # x_bar: true (unpadded) last dim == full array dim -> legal block
        pl.BlockSpec((batch_tile, n_input), lambda i: (i, 0)),
        # z: lane-padded (128) for dense stores; column slice after is tiny
        pl.BlockSpec((batch_tile, dims_out_p[3]), lambda i: (i, 0)),
    )
    out_shape = (
        jax.ShapeDtypeStruct((n_pad, n_input), out_dtype),
        jax.ShapeDtypeStruct((n_pad, dims_out_p[3]), out_dtype),
    )

    # ---- cost hint (true dims) + per-generation scoped-VMEM budget ----
    flops = 2 * n * sum(di * do for di, do in zip(dims_in, dims_out))
    resident_bytes = sum(int(p.size) * p.dtype.itemsize for p in flat_params)
    io_bytes = (n * n_input * c_itemsize
                + n * (n_input + n_z) * o_itemsize)
    if vmem_limit_bytes is None:
        cap = _vmem_capacity_bytes()
        max_width = max(dims_out_p)
        in_tiles = 2 * batch_tile * dims_in_p[0] * c_itemsize      # dbl-buffered
        out_tiles = 2 * batch_tile * (n_input + dims_out_p[3]) * o_itemsize
        act_chain = 2 * batch_tile * max_width * c_itemsize        # live h's
        f32_scratch = 2 * batch_tile * max_width * 4               # pre-cast acc
        budget = (resident_bytes + in_tiles + out_tiles + act_chain
                  + f32_scratch + (4 << 20))
        vmem_limit_bytes = max(min(budget, cap - (2 << 20)), 1 << 20)

    kernel = functools.partial(_ae_kernel, compute_dtype=compute_dtype,
                               xbar_cols=n_input)
    fn = pl.pallas_call(
        kernel,
        grid=(n_pad // batch_tile,),
        in_specs=[x_spec] + param_specs,
        out_specs=out_specs,
        out_shape=out_shape,
        compiler_params=pltpu.CompilerParams(
            dimension_semantics=("parallel",),
            vmem_limit_bytes=int(vmem_limit_bytes)),
        cost_estimate=pl.CostEstimate(
            flops=flops, transcendentals=0,
            bytes_accessed=resident_bytes + io_bytes),
    )
    xbar_p, z_p = fn(x_p, *flat_params)

    x_bar = xbar_p if n_pad == n else xbar_p[:n]
    z = z_p[:n, :n_z] if (n_pad != n or dims_out_p[3] != n_z) else z_p
    return x_bar, z


def init_linear_params(key, in_dim, out_dim):
    """Deterministic init mimicking torch.nn.Linear default (uniform +-1/sqrt(fan_in))."""
    kw, kb = jax.random.split(key)
    bound = 1.0 / jnp.sqrt(jnp.float32(in_dim))
    w = jax.random.uniform(kw, (in_dim, out_dim), jnp.float32, -bound, bound)
    b = jax.random.uniform(kb, (out_dim,), jnp.float32, -bound, bound)
    return w, b


def ae_reference(x, params):
    """Plain-JAX reference of the same forward pass."""
    relu_flags = [True, True, True, False, True, True, True, False]
    h = x
    z = None
    for idx, ((w, b), relu) in enumerate(zip(params, relu_flags)):
        h = h @ w + b
        if relu:
            h = jnp.maximum(h, 0.0)
        if idx == 3:
            z = h
    return h, z


if __name__ == "__main__":
    # Small, self-consistent dims (real SDCN: n_input=334, enc 500/500/2000, n_z=10).
    n_input = 32
    n_enc_1, n_enc_2, n_enc_3 = 64, 32, 16
    n_z = 10
    n_dec_1, n_dec_2, n_dec_3 = 16, 32, 64
    batch = 300        # deliberately NOT a multiple of the batch tile

    key = jax.random.PRNGKey(0)
    keys = jax.random.split(key, 9)

    layer_dims = [
        (n_input, n_enc_1),   # enc_1
        (n_enc_1, n_enc_2),   # enc_2
        (n_enc_2, n_enc_3),   # enc_3
        (n_enc_3, n_z),       # z_layer
        (n_z, n_dec_1),       # dec_1
        (n_dec_1, n_dec_2),   # dec_2
        (n_dec_2, n_dec_3),   # dec_3
        (n_dec_3, n_input),   # x_bar_layer
    ]
    params = [init_linear_params(keys[i], di, do)
              for i, (di, do) in enumerate(layer_dims)]

    x = jax.random.normal(keys[8], (batch, n_input), jnp.float32)
    x_bar_ref, z_ref = ae_reference(x, params)

    # f32 MXU path: tight numerical check against the plain-JAX reference.
    x_bar, z = ae_forward(x, params, compute_dtype=jnp.float32)
    x_bar, z = jax.block_until_ready((x_bar, z))
    assert x_bar.shape == (batch, n_input) and z.shape == (batch, n_z)
    assert jnp.allclose(x_bar, x_bar_ref, atol=1e-4, rtol=1e-4)
    assert jnp.allclose(z, z_ref, atol=1e-4, rtol=1e-4)

    # Default (performance) path: bf16 operands, f32 accumulation — looser
    # tolerance for reduced-precision operands.  This is what you run at real
    # SDCN sizes on v5e/v6e/v7x.
    x_bar_bf, z_bf = ae_forward(x, params)
    x_bar_bf, z_bf = jax.block_until_ready((x_bar_bf, z_bf))
    assert x_bar_bf.shape == (batch, n_input) and z_bf.shape == (batch, n_z)
    assert jnp.allclose(x_bar_bf, x_bar_ref, atol=5e-2, rtol=5e-2)
    assert jnp.allclose(z_bf, z_ref, atol=5e-2, rtol=5e-2)

    print("KERNEL_OK")
</pallas_src>

<mosaic_0001>
module attributes {stable_mosaic.version = 11 : i64} {
  func.func @_ae_kernel(%arg0: i32, %arg1: memref<152x128xf32, #tpu.memory_space<vmem>>, %arg2: memref<128x128xf32, #tpu.memory_space<vmem>>, %arg3: memref<1x128xf32, #tpu.memory_space<vmem>>, %arg4: memref<128x128xf32, #tpu.memory_space<vmem>>, %arg5: memref<1x128xf32, #tpu.memory_space<vmem>>, %arg6: memref<128x128xf32, #tpu.memory_space<vmem>>, %arg7: memref<1x128xf32, #tpu.memory_space<vmem>>, %arg8: memref<128x128xf32, #tpu.memory_space<vmem>>, %arg9: memref<1x128xf32, #tpu.memory_space<vmem>>, %arg10: memref<128x128xf32, #tpu.memory_space<vmem>>, %arg11: memref<1x128xf32, #tpu.memory_space<vmem>>, %arg12: memref<128x128xf32, #tpu.memory_space<vmem>>, %arg13: memref<1x128xf32, #tpu.memory_space<vmem>>, %arg14: memref<128x128xf32, #tpu.memory_space<vmem>>, %arg15: memref<1x128xf32, #tpu.memory_space<vmem>>, %arg16: memref<128x128xf32, #tpu.memory_space<vmem>>, %arg17: memref<1x128xf32, #tpu.memory_space<vmem>>, %arg18: memref<152x32xf32, #tpu.memory_space<vmem>>, %arg19: memref<152x128xf32, #tpu.memory_space<vmem>>) attributes {dimension_semantics = [#tpu.dimension_semantics<parallel>], iteration_bounds = array<i64: 2>, scalar_prefetch = 0 : i64, scratch_operands = 0 : i64, tpu.core_type = #tpu.core_type<tc>, window_params = [{transform_indices = @transform_0, window_bounds = array<i64: 152, 128>}, {pipeline_mode = #tpu.pipeline_mode<synchronous>, transform_indices = @transform_1, window_bounds = array<i64: 128, 128>}, {pipeline_mode = #tpu.pipeline_mode<synchronous>, transform_indices = @transform_2, window_bounds = array<i64: 1, 128>}, {pipeline_mode = #tpu.pipeline_mode<synchronous>, transform_indices = @transform_3, window_bounds = array<i64: 128, 128>}, {pipeline_mode = #tpu.pipeline_mode<synchronous>, transform_indices = @transform_4, window_bounds = array<i64: 1, 128>}, {pipeline_mode = #tpu.pipeline_mode<synchronous>, transform_indices = @transform_5, window_bounds = array<i64: 128, 128>}, {pipeline_mode = #tpu.pipeline_mode<synchronous>, transform_indices = @transform_6, window_bounds = array<i64: 1, 128>}, {pipeline_mode = #tpu.pipeline_mode<synchronous>, transform_indices = @transform_7, window_bounds = array<i64: 128, 128>}, {pipeline_mode = #tpu.pipeline_mode<synchronous>, transform_indices = @transform_8, window_bounds = array<i64: 1, 128>}, {pipeline_mode = #tpu.pipeline_mode<synchronous>, transform_indices = @transform_9, window_bounds = array<i64: 128, 128>}, {pipeline_mode = #tpu.pipeline_mode<synchronous>, transform_indices = @transform_10, window_bounds = array<i64: 1, 128>}, {pipeline_mode = #tpu.pipeline_mode<synchronous>, transform_indices = @transform_11, window_bounds = array<i64: 128, 128>}, {pipeline_mode = #tpu.pipeline_mode<synchronous>, transform_indices = @transform_12, window_bounds = array<i64: 1, 128>}, {pipeline_mode = #tpu.pipeline_mode<synchronous>, transform_indices = @transform_13, window_bounds = array<i64: 128, 128>}, {pipeline_mode = #tpu.pipeline_mode<synchronous>, transform_indices = @transform_14, window_bounds = array<i64: 1, 128>}, {pipeline_mode = #tpu.pipeline_mode<synchronous>, transform_indices = @transform_15, window_bounds = array<i64: 128, 128>}, {pipeline_mode = #tpu.pipeline_mode<synchronous>, transform_indices = @transform_16, window_bounds = array<i64: 1, 128>}, {transform_indices = @transform_17, window_bounds = array<i64: 152, 32>}, {transform_indices = @transform_18, window_bounds = array<i64: 152, 128>}]} {
    %c0 = arith.constant 0 : index
    %c0_0 = arith.constant 0 : index
    %0 = vector.load %arg1[%c0, %c0_0] : memref<152x128xf32, #tpu.memory_space<vmem>>, vector<152x128xf32>
    %c0_1 = arith.constant 0 : index
    %c0_2 = arith.constant 0 : index
    %1 = vector.load %arg2[%c0_1, %c0_2] : memref<128x128xf32, #tpu.memory_space<vmem>>, vector<128x128xf32>
    %cst = arith.constant dense<0.000000e+00> : vector<152x128xf32>
    %2 = tpu.matmul %0, %1, %cst {dimension_numbers = #tpu.dot_dimension_numbers<[1], [0], [0], [1], [0, 0, 1, 1], [], []>} : vector<152x128xf32>, vector<128x128xf32>, vector<152x128xf32> -> vector<152x128xf32>
    %c0_3 = arith.constant 0 : index
    %c0_4 = arith.constant 0 : index
    %3 = vector.load %arg3[%c0_3, %c0_4] : memref<1x128xf32, #tpu.memory_space<vmem>>, vector<1x128xf32>
    %4 = vector.broadcast %3 : vector<1x128xf32> to vector<152x128xf32>
    %5 = arith.addf %2, %4 : vector<152x128xf32>
    %cst_5 = arith.constant 0.000000e+00 : f32
    %6 = vector.broadcast %cst_5 : f32 to vector<152x128xf32>
    %7 = arith.maximumf %5, %6 : vector<152x128xf32>
    %c0_6 = arith.constant 0 : index
    %c0_7 = arith.constant 0 : index
    %8 = vector.load %arg4[%c0_6, %c0_7] : memref<128x128xf32, #tpu.memory_space<vmem>>, vector<128x128xf32>
    %cst_8 = arith.constant dense<0.000000e+00> : vector<152x128xf32>
    %9 = tpu.matmul %7, %8, %cst_8 {dimension_numbers = #tpu.dot_dimension_numbers<[1], [0], [0], [1], [0, 0, 1, 1], [], []>} : vector<152x128xf32>, vector<128x128xf32>, vector<152x128xf32> -> vector<152x128xf32>
    %c0_9 = arith.constant 0 : index
    %c0_10 = arith.constant 0 : index
    %10 = vector.load %arg5[%c0_9, %c0_10] : memref<1x128xf32, #tpu.memory_space<vmem>>, vector<1x128xf32>
    %11 = vector.broadcast %10 : vector<1x128xf32> to vector<152x128xf32>
    %12 = arith.addf %9, %11 : vector<152x128xf32>
    %cst_11 = arith.constant 0.000000e+00 : f32
    %13 = vector.broadcast %cst_11 : f32 to vector<152x128xf32>
    %14 = arith.maximumf %12, %13 : vector<152x128xf32>
    %c0_12 = arith.constant 0 : index
    %c0_13 = arith.constant 0 : index
    %15 = vector.load %arg6[%c0_12, %c0_13] : memref<128x128xf32, #tpu.memory_space<vmem>>, vector<128x128xf32>
    %cst_14 = arith.constant dense<0.000000e+00> : vector<152x128xf32>
    %16 = tpu.matmul %14, %15, %cst_14 {dimension_numbers = #tpu.dot_dimension_numbers<[1], [0], [0], [1], [0, 0, 1, 1], [], []>} : vector<152x128xf32>, vector<128x128xf32>, vector<152x128xf32> -> vector<152x128xf32>
    %c0_15 = arith.constant 0 : index
    %c0_16 = arith.constant 0 : index
    %17 = vector.load %arg7[%c0_15, %c0_16] : memref<1x128xf32, #tpu.memory_space<vmem>>, vector<1x128xf32>
    %18 = vector.broadcast %17 : vector<1x128xf32> to vector<152x128xf32>
    %19 = arith.addf %16, %18 : vector<152x128xf32>
    %cst_17 = arith.constant 0.000000e+00 : f32
    %20 = vector.broadcast %cst_17 : f32 to vector<152x128xf32>
    %21 = arith.maximumf %19, %20 : vector<152x128xf32>
    %c0_18 = arith.constant 0 : index
    %c0_19 = arith.constant 0 : index
    %22 = vector.load %arg8[%c0_18, %c0_19] : memref<128x128xf32, #tpu.memory_space<vmem>>, vector<128x128xf32>
    %cst_20 = arith.constant dense<0.000000e+00> : vector<152x128xf32>
    %23 = tpu.matmul %21, %22, %cst_20 {dimension_numbers = #tpu.dot_dimension_numbers<[1], [0], [0], [1], [0, 0, 1, 1], [], []>} : vector<152x128xf32>, vector<128x128xf32>, vector<152x128xf32> -> vector<152x128xf32>
    %c0_21 = arith.constant 0 : index
    %c0_22 = arith.constant 0 : index
    %24 = vector.load %arg9[%c0_21, %c0_22] : memref<1x128xf32, #tpu.memory_space<vmem>>, vector<1x128xf32>
    %25 = vector.broadcast %24 : vector<1x128xf32> to vector<152x128xf32>
    %26 = arith.addf %23, %25 : vector<152x128xf32>
    %c0_23 = arith.constant 0 : index
    %c0_24 = arith.constant 0 : index
    %27 = vector.load %arg10[%c0_23, %c0_24] : memref<128x128xf32, #tpu.memory_space<vmem>>, vector<128x128xf32>
    %cst_25 = arith.constant dense<0.000000e+00> : vector<152x128xf32>
    %28 = tpu.matmul %26, %27, %cst_25 {dimension_numbers = #tpu.dot_dimension_numbers<[1], [0], [0], [1], [0, 0, 1, 1], [], []>} : vector<152x128xf32>, vector<128x128xf32>, vector<152x128xf32> -> vector<152x128xf32>
    %c0_26 = arith.constant 0 : index
    %c0_27 = arith.constant 0 : index
    %29 = vector.load %arg11[%c0_26, %c0_27] : memref<1x128xf32, #tpu.memory_space<vmem>>, vector<1x128xf32>
    %30 = vector.broadcast %29 : vector<1x128xf32> to vector<152x128xf32>
    %31 = arith.addf %28, %30 : vector<152x128xf32>
    %cst_28 = arith.constant 0.000000e+00 : f32
    %32 = vector.broadcast %cst_28 : f32 to vector<152x128xf32>
    %33 = arith.maximumf %31, %32 : vector<152x128xf32>
    %c0_29 = arith.constant 0 : index
    %c0_30 = arith.constant 0 : index
    %34 = vector.load %arg12[%c0_29, %c0_30] : memref<128x128xf32, #tpu.memory_space<vmem>>, vector<128x128xf32>
    %cst_31 = arith.constant dense<0.000000e+00> : vector<152x128xf32>
    %35 = tpu.matmul %33, %34, %cst_31 {dimension_numbers = #tpu.dot_dimension_numbers<[1], [0], [0], [1], [0, 0, 1, 1], [], []>} : vector<152x128xf32>, vector<128x128xf32>, vector<152x128xf32> -> vector<152x128xf32>
    %c0_32 = arith.constant 0 : index
    %c0_33 = arith.constant 0 : index
    %36 = vector.load %arg13[%c0_32, %c0_33] : memref<1x128xf32, #tpu.memory_space<vmem>>, vector<1x128xf32>
    %37 = vector.broadcast %36 : vector<1x128xf32> to vector<152x128xf32>
    %38 = arith.addf %35, %37 : vector<152x128xf32>
    %cst_34 = arith.constant 0.000000e+00 : f32
    %39 = vector.broadcast %cst_34 : f32 to vector<152x128xf32>
    %40 = arith.maximumf %38, %39 : vector<152x128xf32>
    %c0_35 = arith.constant 0 : index
    %c0_36 = arith.constant 0 : index
    %41 = vector.load %arg14[%c0_35, %c0_36] : memref<128x128xf32, #tpu.memory_space<vmem>>, vector<128x128xf32>
    %cst_37 = arith.constant dense<0.000000e+00> : vector<152x128xf32>
    %42 = tpu.matmul %40, %41, %cst_37 {dimension_numbers = #tpu.dot_dimension_numbers<[1], [0], [0], [1], [0, 0, 1, 1], [], []>} : vector<152x128xf32>, vector<128x128xf32>, vector<152x128xf32> -> vector<152x128xf32>
    %c0_38 = arith.constant 0 : index
    %c0_39 = arith.constant 0 : index
    %43 = vector.load %arg15[%c0_38, %c0_39] : memref<1x128xf32, #tpu.memory_space<vmem>>, vector<1x128xf32>
    %44 = vector.broadcast %43 : vector<1x128xf32> to vector<152x128xf32>
    %45 = arith.addf %42, %44 : vector<152x128xf32>
    %cst_40 = arith.constant 0.000000e+00 : f32
    %46 = vector.broadcast %cst_40 : f32 to vector<152x128xf32>
    %47 = arith.maximumf %45, %46 : vector<152x128xf32>
    %c0_41 = arith.constant 0 : index
    %c0_42 = arith.constant 0 : index
    %48 = vector.load %arg16[%c0_41, %c0_42] : memref<128x128xf32, #tpu.memory_space<vmem>>, vector<128x128xf32>
    %cst_43 = arith.constant dense<0.000000e+00> : vector<152x128xf32>
    %49 = tpu.matmul %47, %48, %cst_43 {dimension_numbers = #tpu.dot_dimension_numbers<[1], [0], [0], [1], [0, 0, 1, 1], [], []>} : vector<152x128xf32>, vector<128x128xf32>, vector<152x128xf32> -> vector<152x128xf32>
    %c0_44 = arith.constant 0 : index
    %c0_45 = arith.constant 0 : index
    %50 = vector.load %arg17[%c0_44, %c0_45] : memref<1x128xf32, #tpu.memory_space<vmem>>, vector<1x128xf32>
    %51 = vector.broadcast %50 : vector<1x128xf32> to vector<152x128xf32>
    %52 = arith.addf %49, %51 : vector<152x128xf32>
    %c0_46 = arith.constant 0 : index
    %c0_47 = arith.constant 0 : index
    %53 = vector.load %arg19[%c0_46, %c0_47] : memref<152x128xf32, #tpu.memory_space<vmem>>, vector<152x128xf32>
    tpu.vector_store %arg19[%c0_46, %c0_47], %26 {strides = array<i32>} : memref<152x128xf32, #tpu.memory_space<vmem>>, vector<152x128xf32>,
    %54 = vector.extract_strided_slice %52 {offsets = [0, 0], sizes = [152, 32], strides = [1, 1]} : vector<152x128xf32> to vector<152x32xf32>
    %c0_48 = arith.constant 0 : index
    %c0_49 = arith.constant 0 : index
    %55 = vector.load %arg18[%c0_48, %c0_49] : memref<152x32xf32, #tpu.memory_space<vmem>>, vector<152x32xf32>
    tpu.vector_store %arg18[%c0_48, %c0_49], %54 {strides = array<i32>} : memref<152x32xf32, #tpu.memory_space<vmem>>, vector<152x32xf32>,
    return
  }
  func.func @transform_0(%arg0: i32) -> (i32, i32) {
    %c0_i32 = arith.constant 0 : i32
    %c0_i32_0 = arith.constant 0 : i32
    return %arg0, %c0_i32 : i32, i32
  }
  func.func @transform_1(%arg0: i32) -> (i32, i32) {
    %c0_i32 = arith.constant 0 : i32
    %c0_i32_0 = arith.constant 0 : i32
    %c0_i32_1 = arith.constant 0 : i32
    return %c0_i32, %c0_i32_0 : i32, i32
  }
  func.func @transform_2(%arg0: i32) -> (i32, i32) {
    %c0_i32 = arith.constant 0 : i32
    %c0_i32_0 = arith.constant 0 : i32
    %c0_i32_1 = arith.constant 0 : i32
    return %c0_i32, %c0_i32_0 : i32, i32
  }
  func.func @transform_3(%arg0: i32) -> (i32, i32) {
    %c0_i32 = arith.constant 0 : i32
    %c0_i32_0 = arith.constant 0 : i32
    %c0_i32_1 = arith.constant 0 : i32
    return %c0_i32, %c0_i32_0 : i32, i32
  }
  func.func @transform_4(%arg0: i32) -> (i32, i32) {
    %c0_i32 = arith.constant 0 : i32
    %c0_i32_0 = arith.constant 0 : i32
    %c0_i32_1 = arith.constant 0 : i32
    return %c0_i32, %c0_i32_0 : i32, i32
  }
  func.func @transform_5(%arg0: i32) -> (i32, i32) {
    %c0_i32 = arith.constant 0 : i32
    %c0_i32_0 = arith.constant 0 : i32
    %c0_i32_1 = arith.constant 0 : i32
    return %c0_i32, %c0_i32_0 : i32, i32
  }
  func.func @transform_6(%arg0: i32) -> (i32, i32) {
    %c0_i32 = arith.constant 0 : i32
    %c0_i32_0 = arith.constant 0 : i32
    %c0_i32_1 = arith.constant 0 : i32
    return %c0_i32, %c0_i32_0 : i32, i32
  }
  func.func @transform_7(%arg0: i32) -> (i32, i32) {
    %c0_i32 = arith.constant 0 : i32
    %c0_i32_0 = arith.constant 0 : i32
    %c0_i32_1 = arith.constant 0 : i32
    return %c0_i32, %c0_i32_0 : i32, i32
  }
  func.func @transform_8(%arg0: i32) -> (i32, i32) {
    %c0_i32 = arith.constant 0 : i32
    %c0_i32_0 = arith.constant 0 : i32
    %c0_i32_1 = arith.constant 0 : i32
    return %c0_i32, %c0_i32_0 : i32, i32
  }
  func.func @transform_9(%arg0: i32) -> (i32, i32) {
    %c0_i32 = arith.constant 0 : i32
    %c0_i32_0 = arith.constant 0 : i32
    %c0_i32_1 = arith.constant 0 : i32
    return %c0_i32, %c0_i32_0 : i32, i32
  }
  func.func @transform_10(%arg0: i32) -> (i32, i32) {
    %c0_i32 = arith.constant 0 : i32
    %c0_i32_0 = arith.constant 0 : i32
    %c0_i32_1 = arith.constant 0 : i32
    return %c0_i32, %c0_i32_0 : i32, i32
  }
  func.func @transform_11(%arg0: i32) -> (i32, i32) {
    %c0_i32 = arith.constant 0 : i32
    %c0_i32_0 = arith.constant 0 : i32
    %c0_i32_1 = arith.constant 0 : i32
    return %c0_i32, %c0_i32_0 : i32, i32
  }
  func.func @transform_12(%arg0: i32) -> (i32, i32) {
    %c0_i32 = arith.constant 0 : i32
    %c0_i32_0 = arith.constant 0 : i32
    %c0_i32_1 = arith.constant 0 : i32
    return %c0_i32, %c0_i32_0 : i32, i32
  }
  func.func @transform_13(%arg0: i32) -> (i32, i32) {
    %c0_i32 = arith.constant 0 : i32
    %c0_i32_0 = arith.constant 0 : i32
    %c0_i32_1 = arith.constant 0 : i32
    return %c0_i32, %c0_i32_0 : i32, i32
  }
  func.func @transform_14(%arg0: i32) -> (i32, i32) {
    %c0_i32 = arith.constant 0 : i32
    %c0_i32_0 = arith.constant 0 : i32
    %c0_i32_1 = arith.constant 0 : i32
    return %c0_i32, %c0_i32_0 : i32, i32
  }
  func.func @transform_15(%arg0: i32) -> (i32, i32) {
    %c0_i32 = arith.constant 0 : i32
    %c0_i32_0 = arith.constant 0 : i32
    %c0_i32_1 = arith.constant 0 : i32
    return %c0_i32, %c0_i32_0 : i32, i32
  }
  func.func @transform_16(%arg0: i32) -> (i32, i32) {
    %c0_i32 = arith.constant 0 : i32
    %c0_i32_0 = arith.constant 0 : i32
    %c0_i32_1 = arith.constant 0 : i32
    return %c0_i32, %c0_i32_0 : i32, i32
  }
  func.func @transform_17(%arg0: i32) -> (i32, i32) {
    %c0_i32 = arith.constant 0 : i32
    %c0_i32_0 = arith.constant 0 : i32
    return %arg0, %c0_i32 : i32, i32
  }
  func.func @transform_18(%arg0: i32) -> (i32, i32) {
    %c0_i32 = arith.constant 0 : i32
    %c0_i32_0 = arith.constant 0 : i32
    return %arg0, %c0_i32 : i32, i32
  }
}

</mosaic_0001>

<bundles_post_ra>
// kernel: tpu_custom_call.1
= control target key start
LH: loop header
LB: loop body
LE: loop exit
PB: predicated region body
PF: predicated region fallthrough
CT: control target
= control target key end

     0   :  { %s5401_s0 = inlined_call_operand.hbm [shape: f32[304,128], index: 0, kind: input, shape index: {}]   ;;  %s5402_s1 = inlined_call_operand.hbm [shape: f32[128,128], index: 1, kind: input, shape index: {}]   ;;  %s5403_s2 = inlined_call_operand.vmem [shape: f32[1,128], index: 2, kind: input, shape index: {}]   ;;  %s5404_s3 = inlined_call_operand.hbm [shape: f32[128,128], index: 3, kind: input, shape index: {}]   ;;  %s5405_s4 = inlined_call_operand.vmem [shape: f32[1,128], index: 4, kind: input, shape index: {}]   ;;  %s5406_s5 = inlined_call_operand.hbm [shape: f32[128,128], index: 5, kind: input, shape index: {}]   ;;  %s5407_s6 = inlined_call_operand.vmem [shape: f32[1,128], index: 6, kind: input, shape index: {}]   ;;  %s5408_s7 = inlined_call_operand.hbm [shape: f32[128,128], index: 7, kind: input, shape index: {}]   ;;  %s5409_s8 = inlined_call_operand.vmem [shape: f32[1,128], index: 8, kind: input, shape index: {}]   ;;  %s5410_s9 = inlined_call_operand.hbm [shape: f32[128,128], index: 9, kind: input, shape index: {}]   ;;  %s5411_s10 = inlined_call_operand.vmem [shape: f32[1,128], index: 10, kind: input, shape index: {}]   ;;  %s5412_s11 = inlined_call_operand.hbm [shape: f32[128,128], index: 11, kind: input, shape index: {}]   ;;  %s5413_s12 = inlined_call_operand.vmem [shape: f32[1,128], index: 12, kind: input, shape index: {}]   ;;  %s5414_s13 = inlined_call_operand.hbm [shape: f32[128,128], index: 13, kind: input, shape index: {}]   ;;  %s5415_s14 = inlined_call_operand.vmem [shape: f32[1,128], index: 14, kind: input, shape index: {}]   ;;  %s5416_s15 = inlined_call_operand.hbm [shape: f32[128,128], index: 15, kind: input, shape index: {}]   ;;  %s5417_s16 = inlined_call_operand.vmem [shape: f32[1,128], index: 16, kind: input, shape index: {}]   ;;  %s5418_s17 = inlined_call_operand.vmem [shape: f32[304,32], index: 17, kind: output, shape index: {0}]   ;;  %s5419_s18 = inlined_call_operand.hbm [shape: f32[304,128], index: 18, kind: output, shape index: {1}]  }
   0x1   :  { %5429 = sst [smem:[#allocation24_spill]] %s5401_s0 }
   0x2   :  { %5430 = sst [smem:[#allocation25_spill]] %s5402_s1 }
   0x3   :  { %5431 = sst [smem:[#allocation26_spill]] %s5403_s2 }
   0x4   :  { %5432 = sst [smem:[#allocation27_spill]] %s5404_s3 }
   0x5   :  { %5433 = sst [smem:[#allocation28_spill]] %s5405_s4 }
   0x6   :  { %5434 = sst [smem:[#allocation29_spill]] %s5406_s5 }
   0x7   :  { %5435 = sst [smem:[#allocation30_spill]] %s5407_s6 }
   0x8   :  { %5436 = sst [smem:[#allocation31_spill]] %s5409_s8 }
   0x9   :  { %5437 = sst [smem:[#allocation32_spill]] %s5411_s10 }
   0xa   :  { %5438 = sst [smem:[#allocation33_spill]] %s5413_s12 }
   0xb   :  { %5439 = sst [smem:[#allocation34_spill]] %s5415_s14 }
   0xc   :  { %5440 = sst [smem:[#allocation35_spill]] %s5417_s16 }
   0xd   :  { %5441 = sst [smem:[#allocation36_spill]] %s5418_s17 }
   0xe   :  { %5442 = sst [smem:[#allocation37_spill]] %s5419_s18 }
   0xf   :  { %24 = vsyncpa [#allocation3], 0 }
  0x10   :  { %26 = vsyncpa [#allocation3 + $0x1], 0 }
  0x11   :  { %27 = vsyncpa [#allocation6], 0 }
  0x12   :  { %28 = vsyncpa [#allocation9], 0 }
  0x13   :  { %29 = vsyncpa [#allocation12], 0 }
  0x14   :  { %30 = vsyncpa [#allocation15], 0 }
  0x15   :  { %31 = vsyncpa [#allocation4], 0 }
  0x16   :  { %33 = vsyncpa [#allocation4 + $0x1], 0  ;;  %s4364_s27 = smov 0   ;;  %s4366_s28 = smov 0  }
  0x17   :  { %s4368_s29 = smov 0   ;;  %s4370_s30 = smov 0  }
  0x18 LB: > { %s4252_s0 = smov [#allocation5]   ;;  %s4385_s1 = sadd.s32 4294967295, %s4250_s30   ;;  %s4250_s30 = sphi %s4370_s30, %s5482_s30   ;;  %s4246_s29 = sphi %s4368_s29, %s5481_s29   ;;  %s4242_s28 = sphi %s4366_s28, %s5480_s28   ;;  %s4238_s27 = sphi %s4364_s27, %s5479_s27  }
  0x19   : > { %s470_s19 = sshll.u32 %s4252_s0, 4  ;;  %p2560_p0 = scmp.ge.s32.totalorder %s4250_s30, 1  ;;  %s4390_s19 = int_to_ptr.vmem [resolvable:$true] %s470_s19 }
  0x1a   : > { %p5424_p1 = scmp.eq.s32.totalorder %s4385_s1, 0  ;;  %p458_p2 = scmp.lt.s32.totalorder %s4250_s30, 3 }
  0x1b   : > { %s4253_s21 = smov [#allocation8]   ;;  %s4254_s23 = smov [#allocation11]  }
  0x1c   : > { %p4392_p3 = pnand %p2560_p0, %p458_p2  ;;  %s502_s22 = sshll.u32 %s4253_s21, 4  ;;  %s4405_s22 = int_to_ptr.vmem [resolvable:$true] %s502_s22 }
  0x1d   : > { %s534_s24 = sshll.u32 %s4254_s23, 4  ;;  %s5445_s0 = sld [smem:[#allocation25_spill]]  ;;  %s4407_s24 = int_to_ptr.vmem [resolvable:$true] %s534_s24 }
  0x1e   : > { %s5443_s20 = scalar_select %p4392_p3, 1, 0 }
  0x1f   : > { %p3816_p5 = pneg %p4392_p3 }
  0x21   : > { %p4401_p6 = pnand %p3816_p5, %p5424_p1 }
  0x23   : > { %s3914_s17 = scalar_lea.hbm %s5445_s0, 2048  ;;  %p4417_p8 = pneg %p4401_p6 }
  0x24   : > { %p3915_p7 = scmp.ne.s32.totalorder %s5445_s0, %s3914_s17  ;;  %p3921_p11 = scmp.lt.u32.totalorder %s3914_s17, %s5445_s0 }
  0x26   : > { %p3917_p9 = pnand %p4417_p8, %p3915_p7 }
  0x28   : > { %p3918_p10 = pneg %p3917_p9 }
  0x2a   : > { %p3923_p12 = pnand %p3921_p11, %p3918_p10 }
  0x2c   : > { %3926 = shalt.err (!%p3923_p12)
}
  0x2d   : > { %s3927_s16 = scalar_lea.vmem %s4390_s19, 2048  ;;  %p3935_p5 = scmp.lt.s32.totalorder %s4390_s19, %s4390_s19 }
  0x2e   : > { %p3928_p13 = scmp.ne.s32.totalorder %s4390_s19, %s3927_s16  ;;  %p3936_p4 = scmp.lt.s32.totalorder %s3927_s16, %s3927_s16 }
  0x30   : > { %p3930_p0 = pnand %p3928_p13, %p4417_p8  ;;  %p3937_p7 = por %p3936_p4, %p3935_p5 }
  0x32   : > { %p3931_p2 = pneg %p3930_p0 }
  0x34   : > { %p3938_p9 = pnand %p3937_p7, %p3931_p2 }
  0x36   : > { %3941 = shalt.err (!%p3938_p9)
}
  0x37   : > { %s5426_s18 = smov 128   ;;  %s5427_s14 = smov 8  }
  0x38   : > { %3819 = dma.hbm_to_vmem [thread:$0]  (!%p4401_p6), %s5445_s0, 2048, %s4390_s19, [#allocation6], %s5426_s18, %s5426_s18, %s5427_s14  }
  0x39   : > { %s5447_s5 = sld [smem:[#allocation29_spill]] }
  0x3f   : > { %s3942_s16 = scalar_lea.hbm %s5447_s5, 2048 }
  0x40   : > { %p3943_p4 = scmp.ne.s32.totalorder %s5447_s5, %s3942_s16  ;;  %p3949_p12 = scmp.lt.u32.totalorder %s3942_s16, %s5447_s5 }
  0x42   : > { %p3945_p10 = pnand %p3943_p4, %p4417_p8 }
  0x44   : > { %p3946_p11 = pneg %p3945_p10 }
  0x46   : > { %p3951_p13 = pnand %p3949_p12, %p3946_p11 }
  0x48   : > { %3954 = shalt.err (!%p3951_p13)
}
  0x49   : > { %s3955_s19 = scalar_lea.vmem %s4405_s22, 2048  ;;  %p3963_p7 = scmp.lt.s32.totalorder %s4405_s22, %s4405_s22 }
  0x4a   : > { %p3956_p0 = scmp.ne.s32.totalorder %s4405_s22, %s3955_s19  ;;  %p3964_p9 = scmp.lt.s32.totalorder %s3955_s19, %s3955_s19 }
  0x4c   : > { %p3958_p2 = pnand %p3956_p0, %p4417_p8  ;;  %p3965_p4 = por %p3964_p9, %p3963_p7 }
  0x4e   : > { %p3959_p5 = pneg %p3958_p2 }
  0x50   : > { %p3966_p10 = pnand %p3965_p4, %p3959_p5 }
  0x52   : > { %3969 = shalt.err (!%p3966_p10)
}
  0x53   : > { %3825 = dma.hbm_to_vmem [thread:$0]  (!%p4401_p6), %s5447_s5, 2048, %s4405_s22, [#allocation9], %s5426_s18, %s5426_s18, %s5427_s14  }
  0x54   : > { %s3970_s17 = scalar_lea.hbm %s5410_s9, 2048 }
  0x55   : > { %p3971_p11 = scmp.ne.s32.totalorder %s5410_s9, %s3970_s17  ;;  %p3977_p0 = scmp.lt.u32.totalorder %s3970_s17, %s5410_s9 }
  0x57   : > { %p3973_p12 = pnand %p3971_p11, %p4417_p8 }
  0x59   : > { %p3974_p13 = pneg %p3973_p12 }
  0x5b   : > { %p3979_p2 = pnand %p3977_p0, %p3974_p13 }
  0x5d   : > { %3982 = shalt.err (!%p3979_p2)
}
  0x5e   : > { %s3983_s22 = scalar_lea.vmem %s4407_s24, 2048  ;;  %p3991_p4 = scmp.lt.s32.totalorder %s4407_s24, %s4407_s24 }
  0x5f   : > { %p3984_p5 = scmp.ne.s32.totalorder %s4407_s24, %s3983_s22  ;;  %p3992_p10 = scmp.lt.s32.totalorder %s3983_s22, %s3983_s22 }
  0x61   : > { %p3986_p7 = pnand %p3984_p5, %p4417_p8  ;;  %p3993_p11 = por %p3992_p10, %p3991_p4 }
  0x63   : > { %p3987_p9 = pneg %p3986_p7 }
  0x65   : > { %p3994_p12 = pnand %p3993_p11, %p3987_p9 }
  0x67   : > { %3997 = shalt.err (!%p3994_p12)
}
  0x68   : > { %3831 = dma.hbm_to_vmem [thread:$0]  (!%p4401_p6), %s5410_s9, 2048, %s4407_s24, [#allocation12], %s5426_s18, %s5426_s18, %s5427_s14  }
  0x69   : > { %s4257_s8 = smov [#allocation14]   ;;  %s4258_s12 = smov [#allocation7]  }
  0x6a   : > { %s566_s10 = sshll.u32 %s4257_s8, 4  ;;  %s486_s17 = sshll.u32 %s4258_s12, 4  ;;  %s567_s10 = int_to_ptr.vmem [resolvable:$true] %s566_s10  ;;  %s487_s17 = int_to_ptr.vmem [resolvable:$true] %s486_s17 }
  0x6b   : > { %s3998_s23 = scalar_lea.hbm %s5414_s13, 2048 }
  0x6c   : > { %p3999_p13 = scmp.ne.s32.totalorder %s5414_s13, %s3998_s23  ;;  %p4005_p5 = scmp.lt.u32.totalorder %s3998_s23, %s5414_s13 }
  0x6e   : > { %p4001_p0 = pnand %p3999_p13, %p4417_p8 }
  0x70   : > { %p4002_p2 = pneg %p4001_p0 }
  0x72   : > { %p4007_p7 = pnand %p4005_p5, %p4002_p2 }
  0x74   : > { %4010 = shalt.err (!%p4007_p7)
}
  0x75   : > { %s4011_s24 = scalar_lea.vmem %s567_s10, 2048  ;;  %p4019_p11 = scmp.lt.s32.totalorder %s567_s10, %s567_s10 }
  0x76   : > { %p4012_p9 = scmp.ne.s32.totalorder %s567_s10, %s4011_s24  ;;  %p4020_p12 = scmp.lt.s32.totalorder %s4011_s24, %s4011_s24 }
  0x78   : > { %p4014_p4 = pnand %p4012_p9, %p4417_p8  ;;  %p4021_p1 = por %p4020_p12, %p4019_p11 }
  0x7a   : > { %p4015_p10 = pneg %p4014_p4 }
  0x7c   : > { %p4022_p3 = pnand %p4021_p1, %p4015_p10 }
  0x7e   : > { %4025 = shalt.err (!%p4022_p3)
}
  0x7f   : > { %3837 = dma.hbm_to_vmem [thread:$0]  (!%p4401_p6), %s5414_s13, 2048, %s567_s10, [#allocation15], %s5426_s18, %s5426_s18, %s5427_s14  }
  0x80   : > { %s5448_s3 = sld [smem:[#allocation27_spill]] }
  0x86   : > { %s4026_s25 = scalar_lea.hbm %s5448_s3, 2048 }
  0x87   : > { %p4027_p1 = scmp.ne.s32.totalorder %s5448_s3, %s4026_s25  ;;  %p4033_p0 = scmp.lt.u32.totalorder %s4026_s25, %s5448_s3 }
  0x89   : > { %p4029_p3 = pnand %p4027_p1, %p4417_p8 }
  0x8b   : > { %p4030_p13 = pneg %p4029_p3 }
  0x8d   : > { %p4035_p2 = pnand %p4033_p0, %p4030_p13 }
  0x8f   : > { %4038 = shalt.err (!%p4035_p2)
}
  0x90   : > { %s4039_s19 = scalar_lea.vmem %s487_s17, 2048  ;;  %p4047_p4 = scmp.lt.s32.totalorder %s487_s17, %s487_s17 }
  0x91   : > { %p4040_p5 = scmp.ne.s32.totalorder %s487_s17, %s4039_s19  ;;  %p4048_p10 = scmp.lt.s32.totalorder %s4039_s19, %s4039_s19 }
  0x93   : > { %p4042_p7 = pnand %p4040_p5, %p4417_p8  ;;  %p4049_p11 = por %p4048_p10, %p4047_p4 }
  0x95   : > { %p4043_p9 = pneg %p4042_p7 }
  0x97   : > { %p4050_p12 = pnand %p4049_p11, %p4043_p9 }
  0x99   : > { %4053 = shalt.err (!%p4050_p12)
}
  0x9a   : > { %3822 = dma.hbm_to_vmem [thread:$0]  (!%p4401_p6), %s5448_s3, 2048, %s487_s17, [#allocation6], %s5426_s18, %s5426_s18, %s5427_s14  }
  0x9b   : > { %s4259_s0 = smov [#allocation10]   ;;  %s4260_s8 = smov [#allocation13]  }
  0x9c   : > { %s518_s6 = sshll.u32 %s4259_s0, 4  ;;  %s550_s12 = sshll.u32 %s4260_s8, 4  ;;  %s519_s6 = int_to_ptr.vmem [resolvable:$true] %s518_s6  ;;  %s551_s12 = int_to_ptr.vmem [resolvable:$true] %s550_s12 }
  0x9d   : > { %s4054_s23 = scalar_lea.hbm %s5408_s7, 2048 }
  0x9e   : > { %p4055_p1 = scmp.ne.s32.totalorder %s5408_s7, %s4054_s23  ;;  %p4061_p0 = scmp.lt.u32.totalorder %s4054_s23, %s5408_s7 }
  0xa0   : > { %p4057_p3 = pnand %p4055_p1, %p4417_p8 }
  0xa2   : > { %p4058_p13 = pneg %p4057_p3 }
  0xa4   : > { %p4063_p2 = pnand %p4061_p0, %p4058_p13 }
  0xa6   : > { %4066 = shalt.err (!%p4063_p2)
}
  0xa7   : > { %s4067_s17 = scalar_lea.vmem %s519_s6, 2048  ;;  %p4075_p4 = scmp.lt.s32.totalorder %s519_s6, %s519_s6 }
  0xa8   : > { %p4068_p5 = scmp.ne.s32.totalorder %s519_s6, %s4067_s17  ;;  %p4076_p10 = scmp.lt.s32.totalorder %s4067_s17, %s4067_s17 }
  0xaa   : > { %p4070_p7 = pnand %p4068_p5, %p4417_p8  ;;  %p4077_p11 = por %p4076_p10, %p4075_p4 }
  0xac   : > { %p4071_p9 = pneg %p4070_p7 }
  0xae   : > { %p4078_p12 = pnand %p4077_p11, %p4071_p9 }
  0xb0   : > { %4081 = shalt.err (!%p4078_p12)
}
  0xb1   : > { %3828 = dma.hbm_to_vmem [thread:$0]  (!%p4401_p6), %s5408_s7, 2048, %s519_s6, [#allocation9], %s5426_s18, %s5426_s18, %s5427_s14  }
  0xb2   : > { %s4082_s26 = scalar_lea.hbm %s5412_s11, 2048 }
  0xb3   : > { %p4083_p1 = scmp.ne.s32.totalorder %s5412_s11, %s4082_s26  ;;  %p4089_p0 = scmp.lt.u32.totalorder %s4082_s26, %s5412_s11 }
  0xb5   : > { %p4085_p3 = pnand %p4083_p1, %p4417_p8 }
  0xb7   : > { %p4086_p13 = pneg %p4085_p3 }
  0xb9   : > { %p4091_p2 = pnand %p4089_p0, %p4086_p13 }
  0xbb   : > { %4094 = shalt.err (!%p4091_p2)
}
  0xbc   : > { %s4095_s10 = scalar_lea.vmem %s551_s12, 2048  ;;  %p4103_p4 = scmp.lt.s32.totalorder %s551_s12, %s551_s12 }
  0xbd   : > { %p4096_p5 = scmp.ne.s32.totalorder %s551_s12, %s4095_s10  ;;  %p4104_p10 = scmp.lt.s32.totalorder %s4095_s10, %s4095_s10 }
  0xbf   : > { %p4098_p7 = pnand %p4096_p5, %p4417_p8  ;;  %p4105_p11 = por %p4104_p10, %p4103_p4 }
  0xc1   : > { %p4099_p9 = pneg %p4098_p7 }
  0xc3   : > { %p4106_p12 = pnand %p4105_p11, %p4099_p9 }
  0xc5   : > { %4109 = shalt.err (!%p4106_p12)
}
  0xc6   : > { %3834 = dma.hbm_to_vmem [thread:$0]  (!%p4401_p6), %s5412_s11, 2048, %s551_s12, [#allocation12], %s5426_s18, %s5426_s18, %s5427_s14  }
  0xc7   : > { %s4261_s24 = smov [#allocation16]   ;;  %s4110_s26 = scalar_lea.hbm %s5416_s15, 2048 }
  0xc8   : > { %s582_s0 = sshll.u32 %s4261_s24, 4  ;;  %p4111_p1 = scmp.ne.s32.totalorder %s5416_s15, %s4110_s26  ;;  %s583_s0 = int_to_ptr.vmem [resolvable:$true] %s582_s0 }
  0xc9   : > { %p4117_p0 = scmp.lt.u32.totalorder %s4110_s26, %s5416_s15 }
  0xca   : > { %p4113_p3 = pnand %p4111_p1, %p4417_p8 }
  0xcc   : > { %p4114_p13 = pneg %p4113_p3 }
  0xce   : > { %p4119_p2 = pnand %p4117_p0, %p4114_p13 }
  0xd0   : > { %4122 = shalt.err (!%p4119_p2)
}
  0xd1   : > { %s4123_s12 = scalar_lea.vmem %s583_s0, 2048  ;;  %p4131_p4 = scmp.lt.s32.totalorder %s583_s0, %s583_s0 }
  0xd2   : > { %p4124_p5 = scmp.ne.s32.totalorder %s583_s0, %s4123_s12  ;;  %p4132_p10 = scmp.lt.s32.totalorder %s4123_s12, %s4123_s12 }
  0xd4   : > { %p4126_p7 = pnand %p4124_p5, %p4417_p8  ;;  %p4133_p11 = por %p4132_p10, %p4131_p4 }
  0xd6   : > { %p4127_p9 = pneg %p4126_p7 }
  0xd8   : > { %p4134_p12 = pnand %p4133_p11, %p4127_p9 }
  0xda   : > { %4137 = shalt.err (!%p4134_p12)
}
  0xdb   : > { %3840 = dma.hbm_to_vmem [thread:$0]  (!%p4401_p6), %s5416_s15, 2048, %s583_s0, [#allocation15], %s5426_s18, %s5426_s18, %s5427_s14  }
  0xdc   : > { %s2559_s2 = sadd.s32 4294967294, %s4250_s30   ;;  %s4600_s21 = sadd.s32 1, %s4250_s30  }
  0xdd   : > { %s43_s17 = ssub.s32 %s4250_s30, %s4600_s21  ;;  %s46_s24 = sadd.s32 1, %s4246_s29 }
  0xde   : > { %p44_p8 = scmp.eq.s32.totalorder %s43_s17, 0  ;;  %p53_p1 = scmp.ne.s32.totalorder %s4246_s29, %s4242_s28 }
  0xdf   : > { %p54_p3 = scmp.eq.s32.totalorder %s4250_s30, 0  ;;  %p59_p13 = scmp.ne.s32.totalorder %s4242_s28, %s4238_s27 }
  0xe0   : > { %s4611_s8 = scalar_select %p44_p8, %s4246_s29, %s46_s24  }
  0xe1   : > { %p55_p0 = por %p54_p3, %p53_p1  ;;  %p5449_p2 = scmp.eq.s32.totalorder %s4385_s1, 0 }
  0xe2   : > { %p445_p6 = scmp.eq.s32.totalorder %s4385_s1, 1  ;;  %p451_p7 = scmp.eq.s32.totalorder %s2559_s2, 1 }
  0xe3   : > { %p4615_p5 = por %p5449_p2, %p59_p13  ;;  %p3857_p9 = scmp.lt.s32.totalorder %s4250_s30, 2 }
  0xe4   : > { %s599_s0 = sand.u32 1, %s4246_s29   ;;  %p4622_p4 = por %p445_p6, %p53_p1 }
  0xe5   : > { %p4626_p10 = por %p451_p7, %p59_p13  ;;  %s3778_s16 = smul.u32 152, %s599_s0 }
  0xe6   : > { %s5451_s26 = scalar_select %p4622_p4, 1, 0 }
  0xe7   : > { %s5452_s23 = scalar_select %p4626_p10, 1, 0 }
  0xe8   : > { %s2592_s22 = smul.u32 2432, %s4250_s30  ;;  %p4631_p11 = pnand %p3857_p9, %p55_p0 }
  0xe9   : > { %s5454_s6 = sld [smem:[#allocation24_spill]]  ;;  %s603_s17 = scalar_lea.vmem [#allocation2], %s3778_s16 }
  0xea   : > { %s610_s24 = sshll.u32 %s603_s17, 4  ;;  %s4642_s18 = scalar_lea.sflag [#allocation3], %s599_s0  ;;  %s4640_s24 = int_to_ptr.vmem [resolvable:$true] %s610_s24 }
  0xeb   : > { %p4140_p8 = pneg %p4631_p11 }
  0xef   : > { %s4638_s2 = scalar_lea.hbm %s5454_s6, %s2592_s22  ;;  %s4143_s10 = scalar_lea.hbm %s5454_s6, 4864 }
  0xf0   : > { %s4138_s14 = scalar_lea.hbm %s4638_s2, 2432  ;;  %p4144_p13 = scmp.lt.u32.totalorder %s4638_s2, %s5454_s6 }
  0xf1   : > { %p4139_p12 = scmp.ne.s32.totalorder %s4638_s2, %s4138_s14  ;;  %p4145_p0 = scmp.lt.u32.totalorder %s4143_s10, %s4138_s14 }
  0xf2   : > { %p4147_p6 = scmp.lt.u32.totalorder %s4138_s14, %s4638_s2 }
  0xf3   : > { %p4141_p1 = pnand %p4140_p8, %p4139_p12  ;;  %p4146_p2 = por %p4145_p0, %p4144_p13 }
  0xf5   : > { %p4142_p3 = pneg %p4141_p1  ;;  %p4148_p7 = por %p4147_p6, %p4146_p2 }
  0xf7   : > { %p4149_p9 = pnand %p4148_p7, %p4142_p3 }
  0xf9   : > { %4152 = shalt.err (!%p4149_p9)
}
  0xfa   : > { %s4153_s0 = scalar_lea.vmem %s4640_s24, 2432  ;;  %s4262_s16 = smov [#allocation2]  }
  0xfb   : > { %p4154_p12 = scmp.ne.s32.totalorder %s4640_s24, %s4153_s0  ;;  %s4158_s17 = sshll.u32 %s4262_s16, 4  ;;  %s4159_s17 = int_to_ptr.vmem [resolvable:$false] %s4158_s17 }
  0xfc   : > { %s4160_s3 = scalar_lea.vmem %s4159_s17, 4864  ;;  %p4161_p4 = scmp.lt.s32.totalorder %s4640_s24, %s4159_s17 }
  0xfd   : > { %p4156_p1 = pnand %p4154_p12, %p4140_p8  ;;  %p4162_p13 = scmp.lt.s32.totalorder %s4160_s3, %s4153_s0 }
  0xff   : > { %p4157_p10 = pneg %p4156_p1  ;;  %p4163_p0 = por %p4162_p13, %p4161_p4 }
 0x101   : > { %p4164_p2 = pnand %p4163_p0, %p4157_p10 }
 0x103   : > { %4167 = shalt.err (!%p4164_p2)
}
 0x104   : > { %s5455_s5 = smov 8   ;;  %s5456_s14 = smov 128  }
 0x105   : > { %3844 = dma.hbm_to_vmem [thread:$0]  (!%p4631_p11), %s4638_s2, 2432, %s4640_s24, %s4642_s18, %s5456_s14, %s5456_s14, %s5455_s5  }
 0x106   : > { %p5457_p8 = scmp.ne.s32.totalorder %s5443_s20, 0 }
 0x107   : > { %s4676_s22 = sand.u32 (!%p5457_p8), 1, %s4242_s28  }
 0x108   : > { %622 = sbr.rel (%p5457_p8) target bundleno = 2117 (0x845), region = 88  ;;  %s625_s10 = scalar_lea.sflag (!%p5457_p8), [#allocation3], %s4676_s22 }
 0x109   : > { %s3779_s12 = smul.u32 (!%p5457_p8), 152, %s4676_s22 }
 0x10b   : > { %s4682_s19 = scalar_lea.vmem (!%p5457_p8), [#allocation2], %s3779_s12 }
 0x10f   : > { %4213 = dma.done.wait (%p4615_p5), %s625_s10, 2432  }
 0x110   : > { %4215 = vsyncadd (%p4615_p5), %s625_s10, 4294964864  ;;  %p5458_p4 = scmp.eq.s32.totalorder %s4385_s1, 0 }
 0x112   : > { %4217 = dma.done.wait (%p5458_p4), [#allocation6], 4096   ;;  %p5459_p10 = pmov %p5458_p4 }
 0x113   : > { %p5460_p11 = pmov %p5458_p4 }
 0x114   : > { %4219 = vsyncadd (%p5459_p10), [#allocation6], 4294963200 }
 0x115   : > { %4221 = dma.done.wait (%p5460_p11), [#allocation9], 4096   ;;  %p5461_p3 = pmov %p5458_p4 }
 0x117   : > { %4223 = vsyncadd (%p5461_p3), [#allocation9], 4294963200  ;;  %p5462_p6 = pmov %p5461_p3 }
 0x118   : > { %p5463_p7 = pmov %p5461_p3 }
 0x119   : > { %4225 = dma.done.wait (%p5462_p6), [#allocation12], 4096  }
 0x11a   : > { %4227 = vsyncadd (%p5463_p7), [#allocation12], 4294963200  ;;  %p5464_p5 = pmov %p5461_p3 }
 0x11b   : > { %p5465_p9 = pmov %p5461_p3 }
 0x11c   : > { %4229 = dma.done.wait (%p5464_p5), [#allocation15], 4096  }
 0x11d   : > { %4231 = vsyncadd (%p5465_p9), [#allocation15], 4294963200  ;;  %v4263_v0 = vmov 0.0|0.0   ;;  %vm4264_vm0 = vmmov 0   ;;  %v4265_v1 = vmov 0.0   ;;  %v745_v2 = vld [vmem:[#allocation5] sm:$0xff] }
 0x11e   : > { %3586 = vmatprep.subr.bf16.mxu0 %v4263_v0  ;;  %2906 = vmatprep.mubr.msk.f32.mxu0 %vm4264_vm0, %v4265_v1  ;;  %v746_v3 = vld [vmem:[#allocation5 + $0x8] sm:$0xff]  ;;  %v747_v4 = vld [vmem:[#allocation5 + $0x10] sm:$0xff]  ;;  %v748_v6 = vld [vmem:[#allocation5 + $0x18] sm:$0xff]  ;;  %s5466_s25 = sld [smem:[#allocation26_spill]]  ;;  %s5467_s4 = sld [smem:[#allocation28_spill]] }
 0x11f   : > { %3610 = vmatprep.subr.bf16.mxu1 %v4263_v0  ;;  %2995 = vmatprep.mubr.msk.f32.mxu1 %vm4264_vm0, %v4265_v1  ;;  %v3587_v5 = vpack.c.bf16 %v746_v3, %v745_v2  ;;  %v3590_v7 = vpack.c.bf16 %v748_v6, %v747_v4  ;;  %v749_v8 = vld [vmem:[#allocation5 + $0x20] sm:$0xff]  ;;  %v750_v9 = vld [vmem:[#allocation5 + $0x28] sm:$0xff]  ;;  %v751_v11 = vld [vmem:[#allocation5 + $0x30] sm:$0xff]  ;;  %s5468_s17 = sld [smem:[#allocation30_spill]]  ;;  %s5469_s14 = sld [smem:[#allocation31_spill]] }
 0x120   : > { %v3593_v10 = vpack.c.bf16 %v750_v9, %v749_v8  ;;  %v752_v12 = vld [vmem:[#allocation5 + $0x38] sm:$0xff]  ;;  %v753_v14 = vld [vmem:[#allocation5 + $0x40] sm:$0xff]  ;;  %v754_v15 = vld [vmem:[#allocation5 + $0x48] sm:$0xff]  ;;  %s5009_s10 = scalar_lea.vmem [#allocation17], %s3779_s12  ;;  %s5470_s20 = sld [smem:[#allocation32_spill]] }
 0x121   : > { %3588 = vmatpush3.bf16.msra.mxu0 %v3587_v5  ;;  %v3596_v13 = vpack.c.bf16 %v752_v12, %v751_v11  ;;  %v947_v16 = vld [vmem:[#allocation7] sm:$0xff]  ;;  %v948_v17 = vld [vmem:[#allocation7 + $0x8] sm:$0xff]  ;;  %v949_v18 = vld [vmem:[#allocation7 + $0x10] sm:$0xff]  ;;  %v3599_v21 = vpack.c.bf16 %v754_v15, %v753_v14  ;;  %s5471_s2 = sld [smem:[#allocation33_spill]]  ;;  %s5472_s16 = sld [smem:[#allocation34_spill]] }
 0x122   : > { %3589 = vmatprep.subr.bf16.mxu0 %v4263_v0  ;;  %v950_v19 = vld [vmem:[#allocation7 + $0x18] sm:$0xff]  ;;  %v3611_v20 = vpack.c.bf16 %v948_v17, %v947_v16  ;;  %v755_v22 = vld [vmem:[#allocation5 + $0x50] sm:$0xff]  ;;  %v951_v25 = vld [vmem:[#allocation7 + $0x20] sm:$0xff]  ;;  %s2385_s3 = sshll.u32 %s5009_s10, 4  ;;  %s5473_s12 = sld [smem:[#allocation37_spill]]  ;;  %s5289_s3 = int_to_ptr.vmem [resolvable:$true] %s2385_s3 }
 0x123   : > { %v3614_v23 = vpack.c.bf16 %v950_v19, %v949_v18  ;;  %v756_v24 = vld [vmem:[#allocation5 + $0x58] sm:$0xff]  ;;  %v952_v26 = vld [vmem:[#allocation7 + $0x28] sm:$0xff]  ;;  %v757_v28 = vld [vmem:[#allocation5 + $0x60] sm:$0xff]  ;;  %s4168_s18 = scalar_lea.vmem %s5289_s3, 2432  ;;  %p5474_p1 = scmp.ne.s32.totalorder %s5451_s26, 0 }
 0x124   : > { %3612 = vmatpush3.bf16.msra.mxu1 %v3611_v20  ;;  %v3602_v27 = vpack.c.bf16 %v756_v24, %v755_v22  ;;  %v3617_v29 = vpack.c.bf16 %v952_v26, %v951_v25  ;;  %v758_v30 = vld [vmem:[#allocation5 + $0x68] sm:$0xff]  ;;  %v953_v31 = vld [vmem:[#allocation7 + $0x30] sm:$0xff]  ;;  %v954_v32 = vld [vmem:[#allocation7 + $0x38] sm:$0xff]  ;;  %p4169_p12 = scmp.ne.s32.totalorder %s5289_s3, %s4168_s18 }
 0x125   : > { %3591 = vmatpush3.bf16.msra.mxu0 %v3590_v7  ;;  %3613 = vmatprep.subr.bf16.mxu1 %v4263_v0  ;;  %v3605_v33 = vpack.c.bf16 %v758_v30, %v757_v28  ;;  %v759_v34 = vld [vmem:[#allocation5 + $0x70] sm:$0xff]  ;;  %v3620_v35 = vpack.c.bf16 %v954_v32, %v953_v31  ;;  %v760_v36 = vld [vmem:[#allocation5 + $0x78] sm:$0xff]  ;;  %v955_v37 = vld [vmem:[#allocation7 + $0x40] sm:$0xff] }
 0x126   : > { %3592 = vmatprep.subr.bf16.mxu0 %v4263_v0  ;;  %v956_v38 = vld [vmem:[#allocation7 + $0x48] sm:$0xff]  ;;  %v3608_v39 = vpack.c.bf16 %v760_v36, %v759_v34  ;;  %v957_v41 = vld [vmem:[#allocation7 + $0x50] sm:$0xff]  ;;  %v958_v42 = vld [vmem:[#allocation7 + $0x58] sm:$0xff]  ;;  %p4170_p13 = pnand %p4169_p12, %p5474_p1 }
 0x127   : > { %v3623_v40 = vpack.c.bf16 %v956_v38, %v955_v37  ;;  %v726_v43 = vld [vmem:[%s4682_s19] sm:$0xff]  ;;  %v3626_v44 = vpack.c.bf16 %v958_v42, %v957_v41  ;;  %v959_v45 = vld [vmem:[#allocation7 + $0x60] sm:$0xff]  ;;  %v727_v47 = vld [vmem:[%s4682_s19 + $0x8] sm:$0xff] }
 0x128   : > { %3615 = vmatpush3.bf16.msra.mxu1 %v3614_v23  ;;  %v960_v46 = vld [vmem:[#allocation7 + $0x68] sm:$0xff]  ;;  %v728_v49 = vld [vmem:[%s4682_s19 + $0x10] sm:$0xff]  ;;  %v731_v52 = vld [vmem:[%s4682_s19 + $0x28] sm:$0xff]  ;;  %p4171_p0 = pneg %p4170_p13 }
 0x129   : > { %3594 = vmatpush3.bf16.msra.mxu0 %v3593_v10  ;;  %3616 = vmatprep.subr.bf16.mxu1 %v4263_v0  ;;  %v3629_v48 = vpack.c.bf16 %v960_v46, %v959_v45  ;;  %v729_v50 = vld [vmem:[%s4682_s19 + $0x18] sm:$0xff]  ;;  %v730_v51 = vld [vmem:[%s4682_s19 + $0x20] sm:$0xff]  ;;  %v732_v53 = vld [vmem:[%s4682_s19 + $0x30] sm:$0xff] }
 0x12a   : > { %3595 = vmatprep.subr.bf16.mxu0 %v4263_v0  ;;  %v733_v54 = vld [vmem:[%s4682_s19 + $0x38] sm:$0xff]  ;;  %v734_v55 = vld [vmem:[%s4682_s19 + $0x40] sm:$0xff]  ;;  %v735_v56 = vld [vmem:[%s4682_s19 + $0x48] sm:$0xff] }
 0x12b   : > { %v736_v57 = vld [vmem:[%s4682_s19 + $0x50] sm:$0xff]  ;;  %v737_v58 = vld [vmem:[%s4682_s19 + $0x58] sm:$0xff]  ;;  %v738_v59 = vld [vmem:[%s4682_s19 + $0x60] sm:$0xff] }
 0x12c   : > { %3618 = vmatpush3.bf16.msra.mxu1 %v3617_v29  ;;  %v739_v60 = vld [vmem:[%s4682_s19 + $0x68] sm:$0xff]  ;;  %v740_v61 = vld [vmem:[%s4682_s19 + $0x70] sm:$0xff]  ;;  %v741_v62 = vld [vmem:[%s4682_s19 + $0x78] sm:$0xff] }
 0x12d   : > { %3597 = vmatpush3.bf16.msra.mxu0 %v3596_v13  ;;  %3619 = vmatprep.subr.bf16.mxu1 %v4263_v0  ;;  %v742_v63 = vld [vmem:[%s4682_s19 + $0x80] sm:$0xff]  ;;  %v743_v2 = vld [vmem:[%s4682_s19 + $0x88] sm:$0xff]  ;;  %v744_v3 = vld [vmem:[%s4682_s19 + $0x90] sm:$0xff] }
 0x12e   : > { %3598 = vmatprep.subr.bf16.mxu0 %v4263_v0  ;;  %v961_v4 = vld [vmem:[#allocation7 + $0x70] sm:$0xff]  ;;  %v962_v5 = vld [vmem:[#allocation7 + $0x78] sm:$0xff]  ;;  %v1149_v7 = vld [vmem:[#allocation8] sm:$0xff] }
 0x12f   : > { %v3632_v6 = vpack.c.bf16 %v962_v5, %v961_v4  ;;  %v1150_v8 = vld [vmem:[#allocation8 + $0x8] sm:$0xff]  ;;  %v1151_v9 = vld [vmem:[#allocation8 + $0x10] sm:$0xff]  ;;  %v1152_v11 = vld [vmem:[#allocation8 + $0x18] sm:$0xff] }
 0x130   : > { %3621 = vmatpush3.bf16.msra.mxu1 %v3620_v35  ;;  %v3635_v10 = vpack.c.bf16 %v1150_v8, %v1149_v7  ;;  %v3638_v12 = vpack.c.bf16 %v1152_v11, %v1151_v9  ;;  %v1153_v13 = vld [vmem:[#allocation8 + $0x20] sm:$0xff]  ;;  %v1154_v14 = vld [vmem:[#allocation8 + $0x28] sm:$0xff]  ;;  %v1155_v16 = vld [vmem:[#allocation8 + $0x30] sm:$0xff] }
 0x131   : > { %3600 = vmatpush3.bf16.msra.mxu0 %v3599_v21  ;;  %3622 = vmatprep.subr.bf16.mxu1 %v4263_v0  ;;  %v3641_v15 = vpack.c.bf16 %v1154_v14, %v1153_v13  ;;  %v1156_v17 = vld [vmem:[#allocation8 + $0x38] sm:$0xff]  ;;  %v1157_v19 = vld [vmem:[#allocation8 + $0x40] sm:$0xff]  ;;  %v1158_v20 = vld [vmem:[#allocation8 + $0x48] sm:$0xff] }
 0x132   : > { %3601 = vmatprep.subr.bf16.mxu0 %v4263_v0  ;;  %v3644_v18 = vpack.c.bf16 %v1156_v17, %v1155_v16  ;;  %v3647_v21 = vpack.c.bf16 %v1158_v20, %v1157_v19  ;;  %v1159_v22 = vld [vmem:[#allocation8 + $0x50] sm:$0xff]  ;;  %v1160_v23 = vld [vmem:[#allocation8 + $0x58] sm:$0xff]  ;;  %v1161_v25 = vld [vmem:[#allocation8 + $0x60] sm:$0xff] }
 0x133   : > { %v3650_v24 = vpack.c.bf16 %v1160_v23, %v1159_v22  ;;  %v1162_v26 = vld [vmem:[#allocation8 + $0x68] sm:$0xff]  ;;  %v1163_v28 = vld [vmem:[#allocation8 + $0x70] sm:$0xff]  ;;  %v1164_v29 = vld [vmem:[#allocation8 + $0x78] sm:$0xff] }
 0x134   : > { %3624 = vmatpush3.bf16.msra.mxu1 %v3623_v40  ;;  %v3656_v30 = vpack.c.bf16 %v1164_v29, %v1163_v28  ;;  %v4794_v31 = vld [vmem:[%s5466_s25] ss:$0 sm:$0xff]  ;;  %s4266_s25 = smov [#allocation17]  }
 0x135   : > { %3603 = vmatpush3.bf16.msra.mxu0 %v3602_v27  ;;  %3625 = vmatprep.subr.bf16.mxu1 %v4263_v0  ;;  %v3653_v27 = vpack.c.bf16 %v1162_v26, %v1161_v25 }
 0x136   : > { %3604 = vmatprep.subr.bf16.mxu0 %v4263_v0 }
 0x138   : > { %3627 = vmatpush3.bf16.msra.mxu1 %v3626_v44 }
 0x139   : > { %3606 = vmatpush3.bf16.msra.mxu0 %v3605_v33  ;;  %3628 = vmatprep.subr.bf16.mxu1 %v4263_v0 }
 0x13a   : > { %3607 = vmatprep.subr.bf16.mxu0 %v4263_v0 }
 0x13c   : > { %3630 = vmatpush3.bf16.msra.mxu1 %v3629_v48 }
 0x13d   : > { %3609 = vmatpush3.bf16.msra.mxu0 %v3608_v39  ;;  %3631 = vmatprep.subr.bf16.mxu1 %v4263_v0 }
 0x13e   : > { %3634 = vmatprep.subr.bf16.mxu0 %v4263_v0 }
 0x140   : > { %2907 = vmatmul.mubr.f32.vlgmr.msra.gmra.mrb[0].mxu0 %v726_v43  ;;  %3633 = vmatpush3.bf16.msra.mxu1 %v3632_v6 }
 0x141   : > { %2909 = vmatprep.mubr.msk.f32.mxu0 %vm4264_vm0, %v4265_v1  ;;  %3658 = vmatprep.subr.bf16.mxu1 %v4263_v0 }
 0x142   : > { %3636 = vmatpush3.bf16.msra.mxu0 %v3635_v10 }
 0x143   : > { %3637 = vmatprep.subr.bf16.mxu0 %v4263_v0 }
 0x144   : > { %2910 = vmatmul.mubr.f32.gmra.mrb[2].mxu0 %v727_v47 }
 0x145   : > { %2912 = vmatprep.mubr.msk.f32.mxu0 %vm4264_vm0, %v4265_v1 }
 0x146   : > { %3639 = vmatpush3.bf16.msra.mxu0 %v3638_v12 }
 0x147   : > { %3640 = vmatprep.subr.bf16.mxu0 %v4263_v0 }
 0x148   : > { %2913 = vmatmul.mubr.f32.gmra.mrb[4].mxu0 %v728_v49 }
 0x149   : > { %2915 = vmatprep.mubr.msk.f32.mxu0 %vm4264_vm0, %v4265_v1 }
 0x14a   : > { %3642 = vmatpush3.bf16.msra.mxu0 %v3641_v15 }
 0x14b   : > { %3643 = vmatprep.subr.bf16.mxu0 %v4263_v0 }
 0x14c   : > { %2916 = vmatmul.mubr.f32.gmra.mrb[6].mxu0 %v729_v50 }
 0x14d   : > { %2918 = vmatprep.mubr.msk.f32.mxu0 %vm4264_vm0, %v4265_v1 }
 0x14e   : > { %3645 = vmatpush3.bf16.msra.mxu0 %v3644_v18 }
 0x14f   : > { %3646 = vmatprep.subr.bf16.mxu0 %v4263_v0 }
 0x150   : > { %2919 = vmatmul.mubr.f32.gmra.mrb[8].mxu0 %v730_v51 }
 0x151   : > { %2921 = vmatprep.mubr.msk.f32.mxu0 %vm4264_vm0, %v4265_v1 }
 0x152   : > { %3648 = vmatpush3.bf16.msra.mxu0 %v3647_v21 }
 0x153   : > { %3649 = vmatprep.subr.bf16.mxu0 %v4263_v0 }
 0x154   : > { %2922 = vmatmul.mubr.f32.gmra.mrb[10].mxu0 %v731_v52 }
 0x155   : > { %2924 = vmatprep.mubr.msk.f32.mxu0 %vm4264_vm0, %v4265_v1 }
 0x156   : > { %3651 = vmatpush3.bf16.msra.mxu0 %v3650_v24 }
 0x157   : > { %3652 = vmatprep.subr.bf16.mxu0 %v4263_v0 }
 0x158   : > { %2925 = vmatmul.mubr.f32.gmra.mrb[12].mxu0 %v732_v53 }
 0x159   : > { %2927 = vmatprep.mubr.msk.f32.mxu0 %vm4264_vm0, %v4265_v1 }
 0x15a   : > { %3654 = vmatpush3.bf16.msra.mxu0 %v3653_v27 }
 0x15b   : > { %3655 = vmatprep.subr.bf16.mxu0 %v4263_v0 }
 0x15c   : > { %2928 = vmatmul.mubr.f32.gmra.mrb[14].mxu0 %v733_v54 }
 0x15d   : > { %2930 = vmatprep.mubr.msk.f32.mxu0 %vm4264_vm0, %v4265_v1 }
 0x15e   : > { %3657 = vmatpush3.bf16.msra.mxu0 %v3656_v30 }
 0x15f   : > { %3682 = vmatprep.subr.bf16.mxu0 %v4263_v0 }
 0x160   : > { %2931 = vmatmul.mubr.f32.gmra.mrb[16].mxu0 %v734_v55 }
 0x161   : > { %2933 = vmatprep.mubr.msk.f32.mxu0 %vm4264_vm0, %v4265_v1 }
 0x164   : > { %2934 = vmatmul.mubr.f32.gmra.mrb[18].mxu0 %v735_v56 }
 0x165   : > { %2936 = vmatprep.mubr.msk.f32.mxu0 %vm4264_vm0, %v4265_v1 }
 0x168   : > { %2937 = vmatmul.mubr.f32.gmra.mrb[20].mxu0 %v736_v57 }
 0x169   : > { %2939 = vmatprep.mubr.msk.f32.mxu0 %vm4264_vm0, %v4265_v1 }
 0x16c   : > { %2940 = vmatmul.mubr.f32.gmra.mrb[22].mxu0 %v737_v58 }
 0x16d   : > { %2942 = vmatprep.mubr.msk.f32.mxu0 %vm4264_vm0, %v4265_v1 }
 0x170   : > { %2943 = vmatmul.mubr.f32.gmra.mrb[24].mxu0 %v738_v59 }
 0x171   : > { %2945 = vmatprep.mubr.msk.f32.mxu0 %vm4264_vm0, %v4265_v1 }
 0x174   : > { %2946 = vmatmul.mubr.f32.gmra.mrb[26].mxu0 %v739_v60 }
 0x175   : > { %2948 = vmatprep.mubr.msk.f32.mxu0 %vm4264_vm0, %v4265_v1 }
 0x178   : > { %2949 = vmatmul.mubr.f32.gmra.mrb[28].mxu0 %v740_v61 }
 0x179   : > { %2951 = vmatprep.mubr.msk.f32.mxu0 %vm4264_vm0, %v4265_v1 }
 0x17c   : > { %2952 = vmatmul.mubr.f32.gmra.mrb[30].mxu0 %v741_v62 }
 0x17d   : > { %2954 = vmatprep.mubr.msk.f32.mxu0 %vm4264_vm0, %v4265_v1 }
 0x180   : > { %2955 = vmatmul.mubr.f32.gmra.mrb[32].mxu0 %v742_v63 }
 0x181   : > { %2957 = vmatprep.mubr.msk.f32.mxu0 %vm4264_vm0, %v4265_v1 }
 0x184   : > { %2958 = vmatmul.mubr.f32.gmra.mrb[34].mxu0 %v743_v2 }
 0x185   : > { %2960 = vmatprep.mubr.msk.f32.mxu0 %vm4264_vm0, %v4265_v1 }
 0x188   : > { %2961 = vmatmul.mubr.f32.gmra.mrb[36].mxu0 %v744_v3 }
 0x189   : > { %3084 = vmatprep.mubr.msk.f32.mxu0 %vm4264_vm0, %v4265_v1 }
 0x213   : > { %v834_v32 = vpop.f32.mrb[0].mxu0 }
 0x214   : > { %v835_v33 = vadd.f32 %v4794_v31, %v834_v32  ;;  %v2908_v34 = vpop.f32.mrb[1].mxu0 }
 0x216   : > { %v928_v35 = vmax.f32 %v835_v33, 0.0 }
 0x217   : > { %v839_v36 = vpop.f32.mrb[2].mxu0 }
 0x218   : > { %v840_v37 = vadd.f32 %v4794_v31, %v839_v36  ;;  %v2911_v38 = vpop.f32.mrb[3].mxu0  ;;  %2996 = vmatmul.mubr.f32.vlgmr.msra.gmra.mrb[0].mxu1 %v928_v35 }
 0x219   : > { %2998 = vmatprep.mubr.msk.f32.mxu1 %vm4264_vm0, %v4265_v1 }
 0x21a   : > { %v929_v39 = vmax.f32 %v840_v37, 0.0 }
 0x21b   : > { %v844_v40 = vpop.f32.mrb[4].mxu0 }
 0x21c   : > { %v845_v41 = vadd.f32 %v4794_v31, %v844_v40  ;;  %v2914_v42 = vpop.f32.mrb[5].mxu0  ;;  %2999 = vmatmul.mubr.f32.gmra.mrb[2].mxu1 %v929_v39 }
 0x21d   : > { %3001 = vmatprep.mubr.msk.f32.mxu1 %vm4264_vm0, %v4265_v1 }
 0x21e   : > { %v930_v43 = vmax.f32 %v845_v41, 0.0 }
 0x21f   : > { %v849_v44 = vpop.f32.mrb[6].mxu0 }
 0x220   : > { %v850_v45 = vadd.f32 %v4794_v31, %v849_v44  ;;  %v2917_v46 = vpop.f32.mrb[7].mxu0  ;;  %3002 = vmatmul.mubr.f32.gmra.mrb[4].mxu1 %v930_v43 }
 0x221   : > { %3004 = vmatprep.mubr.msk.f32.mxu1 %vm4264_vm0, %v4265_v1 }
 0x222   : > { %v931_v47 = vmax.f32 %v850_v45, 0.0 }
 0x223   : > { %v854_v48 = vpop.f32.mrb[8].mxu0 }
 0x224   : > { %v855_v49 = vadd.f32 %v4794_v31, %v854_v48  ;;  %v2920_v50 = vpop.f32.mrb[9].mxu0  ;;  %3005 = vmatmul.mubr.f32.gmra.mrb[6].mxu1 %v931_v47  ;;  %v1351_v47 = vld [vmem:[#allocation10] sm:$0xff]  ;;  %v1352_v48 = vld [vmem:[#allocation10 + $0x8] sm:$0xff] }
 0x225   : > { %3007 = vmatprep.mubr.msk.f32.mxu1 %vm4264_vm0, %v4265_v1  ;;  %v3659_v50 = vpack.c.bf16 %v1352_v48, %v1351_v47 }
 0x226   : > { %v932_v51 = vmax.f32 %v855_v49, 0.0  ;;  %v1353_v49 = vld [vmem:[#allocation10 + $0x10] sm:$0xff] }
 0x227   : > { %v859_v52 = vpop.f32.mrb[10].mxu0  ;;  %3660 = vmatpush3.bf16.msra.mxu1 %v3659_v50 }
 0x228   : > { %v860_v53 = vadd.f32 %v4794_v31, %v859_v52  ;;  %v2923_v54 = vpop.f32.mrb[11].mxu0  ;;  %3008 = vmatmul.mubr.f32.gmra.mrb[8].mxu1 %v932_v51  ;;  %v1354_v51 = vld [vmem:[#allocation10 + $0x18] sm:$0xff]  ;;  %3661 = vmatprep.subr.bf16.mxu1 %v4263_v0 }
 0x229   : > { %3010 = vmatprep.mubr.msk.f32.mxu1 %vm4264_vm0, %v4265_v1  ;;  %v3662_v52 = vpack.c.bf16 %v1354_v51, %v1353_v49 }
 0x22a   : > { %v933_v55 = vmax.f32 %v860_v53, 0.0  ;;  %v1356_v53 = vld [vmem:[#allocation10 + $0x28] sm:$0xff] }
 0x22b   : > { %v864_v56 = vpop.f32.mrb[12].mxu0  ;;  %3663 = vmatpush3.bf16.msra.mxu1 %v3662_v52 }
 0x22c   : > { %v865_v57 = vadd.f32 %v4794_v31, %v864_v56  ;;  %v2926_v58 = vpop.f32.mrb[13].mxu0  ;;  %3011 = vmatmul.mubr.f32.gmra.mrb[10].mxu1 %v933_v55  ;;  %3664 = vmatprep.subr.bf16.mxu1 %v4263_v0  ;;  %v1357_v55 = vld [vmem:[#allocation10 + $0x30] sm:$0xff]  ;;  %v1358_v56 = vld [vmem:[#allocation10 + $0x38] sm:$0xff] }
 0x22d   : > { %3013 = vmatprep.mubr.msk.f32.mxu1 %vm4264_vm0, %v4265_v1  ;;  %v1359_v58 = vld [vmem:[#allocation10 + $0x40] sm:$0xff] }
 0x22e   : > { %v934_v59 = vmax.f32 %v865_v57, 0.0  ;;  %v3668_v57 = vpack.c.bf16 %v1358_v56, %v1357_v55 }
 0x22f   : > { %v869_v60 = vpop.f32.mrb[14].mxu0 }
 0x230   : > { %v870_v61 = vadd.f32 %v4794_v31, %v869_v60  ;;  %v2929_v62 = vpop.f32.mrb[15].mxu0  ;;  %3014 = vmatmul.mubr.f32.gmra.mrb[12].mxu1 %v934_v59  ;;  %v1360_v59 = vld [vmem:[#allocation10 + $0x48] sm:$0xff] }
 0x231   : > { %3016 = vmatprep.mubr.msk.f32.mxu1 %vm4264_vm0, %v4265_v1  ;;  %v3671_v60 = vpack.c.bf16 %v1360_v59, %v1359_v58  ;;  %v1362_v62 = vld [vmem:[#allocation10 + $0x58] sm:$0xff] }
 0x232   : > { %v935_v63 = vmax.f32 %v870_v61, 0.0  ;;  %v1361_v61 = vld [vmem:[#allocation10 + $0x50] sm:$0xff] }
 0x233   : > { %v874_v2 = vpop.f32.mrb[16].mxu0 }
 0x234   : > { %v875_v3 = vadd.f32 %v4794_v31, %v874_v2  ;;  %v2932_v4 = vpop.f32.mrb[17].mxu0  ;;  %3017 = vmatmul.mubr.f32.gmra.mrb[14].mxu1 %v935_v63  ;;  %v3674_v63 = vpack.c.bf16 %v1362_v62, %v1361_v61  ;;  %v1363_v2 = vld [vmem:[#allocation10 + $0x60] sm:$0xff] }
 0x235   : > { %3019 = vmatprep.mubr.msk.f32.mxu1 %vm4264_vm0, %v4265_v1 }
 0x236   : > { %v936_v5 = vmax.f32 %v875_v3, 0.0  ;;  %v1364_v3 = vld [vmem:[#allocation10 + $0x68] sm:$0xff] }
 0x237   : > { %v879_v6 = vpop.f32.mrb[18].mxu0  ;;  %v3677_v4 = vpack.c.bf16 %v1364_v3, %v1363_v2 }
 0x238   : > { %v880_v7 = vadd.f32 %v4794_v31, %v879_v6  ;;  %v2935_v8 = vpop.f32.mrb[19].mxu0  ;;  %3020 = vmatmul.mubr.f32.gmra.mrb[16].mxu1 %v936_v5  ;;  %v1365_v5 = vld [vmem:[#allocation10 + $0x70] sm:$0xff]  ;;  %v1366_v6 = vld [vmem:[#allocation10 + $0x78] sm:$0xff] }
 0x239   : > { %3022 = vmatprep.mubr.msk.f32.mxu1 %vm4264_vm0, %v4265_v1  ;;  %v4864_v8 = vld [vmem:[%s5467_s4] ss:$0 sm:$0xff] }
 0x23a   : > { %v937_v9 = vmax.f32 %v880_v7, 0.0  ;;  %v3680_v7 = vpack.c.bf16 %v1366_v6, %v1365_v5 }
 0x23b   : > { %v884_v10 = vpop.f32.mrb[20].mxu0 }
 0x23c   : > { %v885_v11 = vadd.f32 %v4794_v31, %v884_v10  ;;  %v2938_v12 = vpop.f32.mrb[21].mxu0  ;;  %3023 = vmatmul.mubr.f32.gmra.mrb[18].mxu1 %v937_v9 }
 0x23d   : > { %3025 = vmatprep.mubr.msk.f32.mxu1 %vm4264_vm0, %v4265_v1 }
 0x23e   : > { %v938_v13 = vmax.f32 %v885_v11, 0.0 }
 0x23f   : > { %v889_v14 = vpop.f32.mrb[22].mxu0 }
 0x240   : > { %v890_v15 = vadd.f32 %v4794_v31, %v889_v14  ;;  %v2941_v16 = vpop.f32.mrb[23].mxu0  ;;  %3026 = vmatmul.mubr.f32.gmra.mrb[20].mxu1 %v938_v13 }
 0x241   : > { %3028 = vmatprep.mubr.msk.f32.mxu1 %vm4264_vm0, %v4265_v1 }
 0x242   : > { %v939_v17 = vmax.f32 %v890_v15, 0.0 }
 0x243   : > { %v894_v18 = vpop.f32.mrb[24].mxu0 }
 0x244   : > { %v895_v19 = vadd.f32 %v4794_v31, %v894_v18  ;;  %v2944_v20 = vpop.f32.mrb[25].mxu0  ;;  %3029 = vmatmul.mubr.f32.gmra.mrb[22].mxu1 %v939_v17 }
 0x245   : > { %3031 = vmatprep.mubr.msk.f32.mxu1 %vm4264_vm0, %v4265_v1 }
 0x246   : > { %v940_v21 = vmax.f32 %v895_v19, 0.0 }
 0x247   : > { %v899_v22 = vpop.f32.mrb[26].mxu0 }
 0x248   : > { %v900_v23 = vadd.f32 %v4794_v31, %v899_v22  ;;  %v2947_v24 = vpop.f32.mrb[27].mxu0  ;;  %3032 = vmatmul.mubr.f32.gmra.mrb[24].mxu1 %v940_v21 }
 0x249   : > { %3034 = vmatprep.mubr.msk.f32.mxu1 %vm4264_vm0, %v4265_v1 }
 0x24a   : > { %v941_v25 = vmax.f32 %v900_v23, 0.0 }
 0x24b   : > { %v904_v26 = vpop.f32.mrb[28].mxu0 }
 0x24c   : > { %v905_v27 = vadd.f32 %v4794_v31, %v904_v26  ;;  %v2950_v28 = vpop.f32.mrb[29].mxu0  ;;  %3035 = vmatmul.mubr.f32.gmra.mrb[26].mxu1 %v941_v25 }
 0x24d   : > { %3037 = vmatprep.mubr.msk.f32.mxu1 %vm4264_vm0, %v4265_v1 }
 0x24e   : > { %v942_v29 = vmax.f32 %v905_v27, 0.0 }
 0x24f   : > { %v909_v30 = vpop.f32.mrb[30].mxu0 }
 0x250   : > { %v910_v32 = vadd.f32 %v4794_v31, %v909_v30  ;;  %v2953_v33 = vpop.f32.mrb[31].mxu0  ;;  %3038 = vmatmul.mubr.f32.gmra.mrb[28].mxu1 %v942_v29 }
 0x251   : > { %3040 = vmatprep.mubr.msk.f32.mxu1 %vm4264_vm0, %v4265_v1 }
 0x252   : > { %v943_v34 = vmax.f32 %v910_v32, 0.0 }
 0x253   : > { %v914_v35 = vpop.f32.mrb[32].mxu0 }
 0x254   : > { %v915_v36 = vadd.f32 %v4794_v31, %v914_v35  ;;  %v2956_v37 = vpop.f32.mrb[33].mxu0  ;;  %3041 = vmatmul.mubr.f32.gmra.mrb[30].mxu1 %v943_v34 }
 0x255   : > { %3043 = vmatprep.mubr.msk.f32.mxu1 %vm4264_vm0, %v4265_v1 }
 0x256   : > { %v944_v38 = vmax.f32 %v915_v36, 0.0 }
 0x257   : > { %v919_v39 = vpop.f32.mrb[34].mxu0 }
 0x258   : > { %v920_v40 = vadd.f32 %v4794_v31, %v919_v39  ;;  %v2959_v41 = vpop.f32.mrb[35].mxu0  ;;  %3044 = vmatmul.mubr.f32.gmra.mrb[32].mxu1 %v944_v38 }
 0x259   : > { %3046 = vmatprep.mubr.msk.f32.mxu1 %vm4264_vm0, %v4265_v1 }
 0x25a   : > { %v945_v42 = vmax.f32 %v920_v40, 0.0 }
 0x25b   : > { %v924_v43 = vpop.f32.mrb[36].mxu0 }
 0x25c   : > { %v925_v44 = vadd.f32 %v4794_v31, %v924_v43  ;;  %v2962_v45 = vpop.f32.mrb[37].mxu0  ;;  %3047 = vmatmul.mubr.f32.gmra.mrb[34].mxu1 %v945_v42  ;;  %v1355_v31 = vld [vmem:[#allocation10 + $0x20] sm:$0xff] }
 0x25d   : > { %3049 = vmatprep.mubr.msk.f32.mxu1 %vm4264_vm0, %v4265_v1  ;;  %v3665_v54 = vpack.c.bf16 %v1356_v53, %v1355_v31 }
 0x25e   : > { %v946_v46 = vmax.f32 %v925_v44, 0.0 }
 0x25f   : > { %3666 = vmatpush3.bf16.msra.mxu1 %v3665_v54 }
 0x260   : > { %3050 = vmatmul.mubr.f32.gmra.mrb[36].mxu1 %v946_v46  ;;  %3667 = vmatprep.subr.bf16.mxu1 %v4263_v0 }
 0x261   : > { %3173 = vmatprep.mubr.msk.f32.mxu1 %vm4264_vm0, %v4265_v1 }
 0x263   : > { %3669 = vmatpush3.bf16.msra.mxu1 %v3668_v57 }
 0x264   : > { %3670 = vmatprep.subr.bf16.mxu1 %v4263_v0 }
 0x267   : > { %3672 = vmatpush3.bf16.msra.mxu1 %v3671_v60 }
 0x268   : > { %3673 = vmatprep.subr.bf16.mxu1 %v4263_v0 }
 0x26b   : > { %3675 = vmatpush3.bf16.msra.mxu1 %v3674_v63 }
 0x26c   : > { %3676 = vmatprep.subr.bf16.mxu1 %v4263_v0 }
 0x26f   : > { %3678 = vmatpush3.bf16.msra.mxu1 %v3677_v4 }
 0x270   : > { %3679 = vmatprep.subr.bf16.mxu1 %v4263_v0 }
 0x273   : > { %3681 = vmatpush3.bf16.msra.mxu1 %v3680_v7 }
 0x274   : > { %3706 = vmatprep.subr.bf16.mxu1 %v4263_v0 }
 0x2eb   : > { %v1036_v9 = vpop.f32.mrb[0].mxu1 }
 0x2ec   : > { %v1037_v10 = vadd.f32 %v4864_v8, %v1036_v9  ;;  %v2997_v11 = vpop.f32.mrb[1].mxu1 }
 0x2ee   : > { %v1130_v12 = vmax.f32 %v1037_v10, 0.0 }
 0x2ef   : > { %v1041_v13 = vpop.f32.mrb[2].mxu1 }
 0x2f0   : > { %v1042_v14 = vadd.f32 %v4864_v8, %v1041_v13  ;;  %v3000_v15 = vpop.f32.mrb[3].mxu1  ;;  %3085 = vmatmul.mubr.f32.vlgmr.msra.gmra.mrb[38].mxu0 %v1130_v12 }
 0x2f1   : > { %3087 = vmatprep.mubr.msk.f32.mxu0 %vm4264_vm0, %v4265_v1 }
 0x2f2   : > { %v1131_v16 = vmax.f32 %v1042_v14, 0.0 }
 0x2f3   : > { %v1046_v17 = vpop.f32.mrb[4].mxu1 }
 0x2f4   : > { %v1047_v18 = vadd.f32 %v4864_v8, %v1046_v17  ;;  %v3003_v19 = vpop.f32.mrb[5].mxu1  ;;  %3088 = vmatmul.mubr.f32.gmra.mrb[40].mxu0 %v1131_v16 }
 0x2f5   : > { %3090 = vmatprep.mubr.msk.f32.mxu0 %vm4264_vm0, %v4265_v1 }
 0x2f6   : > { %v1132_v20 = vmax.f32 %v1047_v18, 0.0 }
 0x2f7   : > { %v1051_v21 = vpop.f32.mrb[6].mxu1 }
 0x2f8   : > { %v1052_v22 = vadd.f32 %v4864_v8, %v1051_v21  ;;  %v3006_v23 = vpop.f32.mrb[7].mxu1  ;;  %3091 = vmatmul.mubr.f32.gmra.mrb[42].mxu0 %v1132_v20 }
 0x2f9   : > { %3093 = vmatprep.mubr.msk.f32.mxu0 %vm4264_vm0, %v4265_v1 }
 0x2fa   : > { %v1133_v24 = vmax.f32 %v1052_v22, 0.0 }
 0x2fb   : > { %v1056_v25 = vpop.f32.mrb[8].mxu1 }
 0x2fc   : > { %v1057_v26 = vadd.f32 %v4864_v8, %v1056_v25  ;;  %v3009_v27 = vpop.f32.mrb[9].mxu1  ;;  %3094 = vmatmul.mubr.f32.gmra.mrb[44].mxu0 %v1133_v24  ;;  %v1534_v24 = vld [vmem:[#allocation11] sm:$0xff]  ;;  %v1535_v25 = vld [vmem:[#allocation11 + $0x8] sm:$0xff] }
 0x2fd   : > { %3096 = vmatprep.mubr.msk.f32.mxu0 %vm4264_vm0, %v4265_v1  ;;  %v3683_v27 = vpack.c.bf16 %v1535_v25, %v1534_v24 }
 0x2fe   : > { %v1134_v28 = vmax.f32 %v1057_v26, 0.0  ;;  %v1536_v26 = vld [vmem:[#allocation11 + $0x10] sm:$0xff] }
 0x2ff   : > { %v1061_v29 = vpop.f32.mrb[10].mxu1  ;;  %3684 = vmatpush3.bf16.msra.mxu0 %v3683_v27 }
 0x300   : > { %v1062_v30 = vadd.f32 %v4864_v8, %v1061_v29  ;;  %v3012_v32 = vpop.f32.mrb[11].mxu1  ;;  %3097 = vmatmul.mubr.f32.gmra.mrb[46].mxu0 %v1134_v28  ;;  %v1537_v28 = vld [vmem:[#allocation11 + $0x18] sm:$0xff]  ;;  %3685 = vmatprep.subr.bf16.mxu0 %v4263_v0 }
 0x301   : > { %3099 = vmatprep.mubr.msk.f32.mxu0 %vm4264_vm0, %v4265_v1  ;;  %v3686_v29 = vpack.c.bf16 %v1537_v28, %v1536_v26 }
 0x302   : > { %v1135_v33 = vmax.f32 %v1062_v30, 0.0  ;;  %v1539_v30 = vld [vmem:[#allocation11 + $0x28] sm:$0xff] }
 0x303   : > { %v1066_v34 = vpop.f32.mrb[12].mxu1  ;;  %3687 = vmatpush3.bf16.msra.mxu0 %v3686_v29 }
 0x304   : > { %v1067_v35 = vadd.f32 %v4864_v8, %v1066_v34  ;;  %v3015_v36 = vpop.f32.mrb[13].mxu1  ;;  %3100 = vmatmul.mubr.f32.gmra.mrb[48].mxu0 %v1135_v33  ;;  %3688 = vmatprep.subr.bf16.mxu0 %v4263_v0  ;;  %v1540_v33 = vld [vmem:[#allocation11 + $0x30] sm:$0xff]  ;;  %v1541_v34 = vld [vmem:[#allocation11 + $0x38] sm:$0xff] }
 0x305   : > { %3102 = vmatprep.mubr.msk.f32.mxu0 %vm4264_vm0, %v4265_v1  ;;  %v1542_v36 = vld [vmem:[#allocation11 + $0x40] sm:$0xff] }
 0x306   : > { %v1136_v37 = vmax.f32 %v1067_v35, 0.0  ;;  %v3692_v35 = vpack.c.bf16 %v1541_v34, %v1540_v33 }
 0x307   : > { %v1071_v38 = vpop.f32.mrb[14].mxu1 }
 0x308   : > { %v1072_v39 = vadd.f32 %v4864_v8, %v1071_v38  ;;  %v3018_v40 = vpop.f32.mrb[15].mxu1  ;;  %3103 = vmatmul.mubr.f32.gmra.mrb[50].mxu0 %v1136_v37  ;;  %v1543_v37 = vld [vmem:[#allocation11 + $0x48] sm:$0xff] }
 0x309   : > { %3105 = vmatprep.mubr.msk.f32.mxu0 %vm4264_vm0, %v4265_v1  ;;  %v3695_v38 = vpack.c.bf16 %v1543_v37, %v1542_v36  ;;  %v1545_v40 = vld [vmem:[#allocation11 + $0x58] sm:$0xff] }
 0x30a   : > { %v1137_v41 = vmax.f32 %v1072_v39, 0.0  ;;  %v1544_v39 = vld [vmem:[#allocation11 + $0x50] sm:$0xff] }
 0x30b   : > { %v1076_v42 = vpop.f32.mrb[16].mxu1 }
 0x30c   : > { %v1077_v43 = vadd.f32 %v4864_v8, %v1076_v42  ;;  %v3021_v44 = vpop.f32.mrb[17].mxu1  ;;  %3106 = vmatmul.mubr.f32.gmra.mrb[52].mxu0 %v1137_v41  ;;  %v3698_v41 = vpack.c.bf16 %v1545_v40, %v1544_v39  ;;  %v1546_v42 = vld [vmem:[#allocation11 + $0x60] sm:$0xff] }
 0x30d   : > { %3108 = vmatprep.mubr.msk.f32.mxu0 %vm4264_vm0, %v4265_v1 }
 0x30e   : > { %v1138_v45 = vmax.f32 %v1077_v43, 0.0  ;;  %v1547_v43 = vld [vmem:[#allocation11 + $0x68] sm:$0xff] }
 0x30f   : > { %v1081_v46 = vpop.f32.mrb[18].mxu1  ;;  %v3701_v44 = vpack.c.bf16 %v1547_v43, %v1546_v42 }
 0x310   : > { %v1082_v47 = vadd.f32 %v4864_v8, %v1081_v46  ;;  %v3024_v48 = vpop.f32.mrb[19].mxu1  ;;  %3109 = vmatmul.mubr.f32.gmra.mrb[54].mxu0 %v1138_v45  ;;  %v1548_v45 = vld [vmem:[#allocation11 + $0x70] sm:$0xff]  ;;  %v1549_v46 = vld [vmem:[#allocation11 + $0x78] sm:$0xff] }
 0x311   : > { %3111 = vmatprep.mubr.msk.f32.mxu0 %vm4264_vm0, %v4265_v1  ;;  %v4934_v48 = vld [vmem:[%s5468_s17] ss:$0 sm:$0xff]  ;;  %s2593_s17 = smul.u32 2432, %s4385_s1 }
 0x312   : > { %v1139_v49 = vmax.f32 %v1082_v47, 0.0  ;;  %v3704_v47 = vpack.c.bf16 %v1549_v46, %v1548_v45 }
 0x313   : > { %v1086_v50 = vpop.f32.mrb[20].mxu1  ;;  %s5287_s19 = scalar_lea.hbm %s5473_s12, %s2593_s17 }
 0x314   : > { %v1087_v51 = vadd.f32 %v4864_v8, %v1086_v50  ;;  %v3027_v52 = vpop.f32.mrb[21].mxu1  ;;  %3112 = vmatmul.mubr.f32.gmra.mrb[56].mxu0 %v1139_v49 }
 0x315   : > { %3114 = vmatprep.mubr.msk.f32.mxu0 %vm4264_vm0, %v4265_v1 }
 0x316   : > { %v1140_v31 = vmax.f32 %v1087_v51, 0.0 }
 0x317   : > { %v1091_v53 = vpop.f32.mrb[22].mxu1 }
 0x318   : > { %v1092_v54 = vadd.f32 %v4864_v8, %v1091_v53  ;;  %v3030_v55 = vpop.f32.mrb[23].mxu1  ;;  %3115 = vmatmul.mubr.f32.gmra.mrb[58].mxu0 %v1140_v31 }
 0x319   : > { %3117 = vmatprep.mubr.msk.f32.mxu0 %vm4264_vm0, %v4265_v1 }
 0x31a   : > { %v1141_v56 = vmax.f32 %v1092_v54, 0.0 }
 0x31b   : > { %v1096_v57 = vpop.f32.mrb[24].mxu1 }
 0x31c   : > { %v1097_v58 = vadd.f32 %v4864_v8, %v1096_v57  ;;  %v3033_v59 = vpop.f32.mrb[25].mxu1  ;;  %3118 = vmatmul.mubr.f32.gmra.mrb[60].mxu0 %v1141_v56 }
 0x31d   : > { %3120 = vmatprep.mubr.msk.f32.mxu0 %vm4264_vm0, %v4265_v1 }
 0x31e   : > { %v1142_v60 = vmax.f32 %v1097_v58, 0.0 }
 0x31f   : > { %v1101_v61 = vpop.f32.mrb[26].mxu1 }
 0x320   : > { %v1102_v62 = vadd.f32 %v4864_v8, %v1101_v61  ;;  %v3036_v63 = vpop.f32.mrb[27].mxu1  ;;  %3121 = vmatmul.mubr.f32.gmra.mrb[62].mxu0 %v1142_v60 }
 0x321   : > { %3123 = vmatprep.mubr.msk.f32.mxu0 %vm4264_vm0, %v4265_v1 }
 0x322   : > { %v1143_v2 = vmax.f32 %v1102_v62, 0.0 }
 0x323   : > { %v1106_v3 = vpop.f32.mrb[28].mxu1 }
 0x324   : > { %v1107_v4 = vadd.f32 %v4864_v8, %v1106_v3  ;;  %v3039_v5 = vpop.f32.mrb[29].mxu1  ;;  %3124 = vmatmul.mubr.f32.gmra.mrb[64].mxu0 %v1143_v2 }
 0x325   : > { %3126 = vmatprep.mubr.msk.f32.mxu0 %vm4264_vm0, %v4265_v1 }
 0x326   : > { %v1144_v6 = vmax.f32 %v1107_v4, 0.0 }
 0x327   : > { %v1111_v7 = vpop.f32.mrb[30].mxu1 }
 0x328   : > { %v1112_v9 = vadd.f32 %v4864_v8, %v1111_v7  ;;  %v3042_v10 = vpop.f32.mrb[31].mxu1  ;;  %3127 = vmatmul.mubr.f32.gmra.mrb[66].mxu0 %v1144_v6 }
 0x329   : > { %3129 = vmatprep.mubr.msk.f32.mxu0 %vm4264_vm0, %v4265_v1 }
 0x32a   : > { %v1145_v11 = vmax.f32 %v1112_v9, 0.0 }
 0x32b   : > { %v1116_v12 = vpop.f32.mrb[32].mxu1 }
 0x32c   : > { %v1117_v13 = vadd.f32 %v4864_v8, %v1116_v12  ;;  %v3045_v14 = vpop.f32.mrb[33].mxu1  ;;  %3130 = vmatmul.mubr.f32.gmra.mrb[68].mxu0 %v1145_v11 }
 0x32d   : > { %3132 = vmatprep.mubr.msk.f32.mxu0 %vm4264_vm0, %v4265_v1 }
 0x32e   : > { %v1146_v15 = vmax.f32 %v1117_v13, 0.0 }
 0x32f   : > { %v1121_v16 = vpop.f32.mrb[34].mxu1 }
 0x330   : > { %v1122_v17 = vadd.f32 %v4864_v8, %v1121_v16  ;;  %v3048_v18 = vpop.f32.mrb[35].mxu1  ;;  %3133 = vmatmul.mubr.f32.gmra.mrb[70].mxu0 %v1146_v15 }
 0x331   : > { %3135 = vmatprep.mubr.msk.f32.mxu0 %vm4264_vm0, %v4265_v1 }
 0x332   : > { %v1147_v19 = vmax.f32 %v1122_v17, 0.0 }
 0x333   : > { %v1126_v20 = vpop.f32.mrb[36].mxu1 }
 0x334   : > { %v1127_v21 = vadd.f32 %v4864_v8, %v1126_v20  ;;  %v3051_v22 = vpop.f32.mrb[37].mxu1  ;;  %3136 = vmatmul.mubr.f32.gmra.mrb[72].mxu0 %v1147_v19  ;;  %v1538_v8 = vld [vmem:[#allocation11 + $0x20] sm:$0xff] }
 0x335   : > { %3138 = vmatprep.mubr.msk.f32.mxu0 %vm4264_vm0, %v4265_v1  ;;  %v3689_v32 = vpack.c.bf16 %v1539_v30, %v1538_v8 }
 0x336   : > { %v1148_v23 = vmax.f32 %v1127_v21, 0.0 }
 0x337   : > { %3690 = vmatpush3.bf16.msra.mxu0 %v3689_v32 }
 0x338   : > { %3139 = vmatmul.mubr.f32.gmra.mrb[74].mxu0 %v1148_v23  ;;  %3691 = vmatprep.subr.bf16.mxu0 %v4263_v0 }
 0x339   : > { %3262 = vmatprep.mubr.msk.f32.mxu0 %vm4264_vm0, %v4265_v1 }
 0x33b   : > { %3693 = vmatpush3.bf16.msra.mxu0 %v3692_v35 }
 0x33c   : > { %3694 = vmatprep.subr.bf16.mxu0 %v4263_v0 }
 0x33f   : > { %3696 = vmatpush3.bf16.msra.mxu0 %v3695_v38 }
 0x340   : > { %3697 = vmatprep.subr.bf16.mxu0 %v4263_v0 }
 0x343   : > { %3699 = vmatpush3.bf16.msra.mxu0 %v3698_v41 }
 0x344   : > { %3700 = vmatprep.subr.bf16.mxu0 %v4263_v0 }
 0x347   : > { %3702 = vmatpush3.bf16.msra.mxu0 %v3701_v44 }
 0x348   : > { %3703 = vmatprep.subr.bf16.mxu0 %v4263_v0 }
 0x34b   : > { %3705 = vmatpush3.bf16.msra.mxu0 %v3704_v47 }
 0x34c   : > { %3730 = vmatprep.subr.bf16.mxu0 %v4263_v0 }
 0x3c3   : > { %v1238_v49 = vpop.f32.mrb[38].mxu0 }
 0x3c4   : > { %v1239_v50 = vadd.f32 %v4934_v48, %v1238_v49  ;;  %v3086_v51 = vpop.f32.mrb[39].mxu0 }
 0x3c6   : > { %v1332_v52 = vmax.f32 %v1239_v50, 0.0 }
 0x3c7   : > { %v1243_v31 = vpop.f32.mrb[40].mxu0 }
 0x3c8   : > { %v1244_v53 = vadd.f32 %v4934_v48, %v1243_v31  ;;  %v3089_v54 = vpop.f32.mrb[41].mxu0  ;;  %3174 = vmatmul.mubr.f32.vlgmr.msra.gmra.mrb[38].mxu1 %v1332_v52 }
 0x3c9   : > { %3176 = vmatprep.mubr.msk.f32.mxu1 %vm4264_vm0, %v4265_v1 }
 0x3ca   : > { %v1333_v55 = vmax.f32 %v1244_v53, 0.0 }
 0x3cb   : > { %v1248_v56 = vpop.f32.mrb[42].mxu0 }
 0x3cc   : > { %v1249_v57 = vadd.f32 %v4934_v48, %v1248_v56  ;;  %v3092_v58 = vpop.f32.mrb[43].mxu0  ;;  %3177 = vmatmul.mubr.f32.gmra.mrb[40].mxu1 %v1333_v55 }
 0x3cd   : > { %3179 = vmatprep.mubr.msk.f32.mxu1 %vm4264_vm0, %v4265_v1 }
 0x3ce   : > { %v1334_v59 = vmax.f32 %v1249_v57, 0.0 }
 0x3cf   : > { %v1253_v60 = vpop.f32.mrb[44].mxu0 }
 0x3d0   : > { %v1254_v61 = vadd.f32 %v4934_v48, %v1253_v60  ;;  %v3095_v62 = vpop.f32.mrb[45].mxu0  ;;  %3180 = vmatmul.mubr.f32.gmra.mrb[42].mxu1 %v1334_v59 }
 0x3d1   : > { %3182 = vmatprep.mubr.msk.f32.mxu1 %vm4264_vm0, %v4265_v1 }
 0x3d2   : > { %v1335_v63 = vmax.f32 %v1254_v61, 0.0 }
 0x3d3   : > { %v1258_v2 = vpop.f32.mrb[46].mxu0 }
 0x3d4   : > { %v1259_v3 = vadd.f32 %v4934_v48, %v1258_v2  ;;  %v3098_v4 = vpop.f32.mrb[47].mxu0  ;;  %3183 = vmatmul.mubr.f32.gmra.mrb[44].mxu1 %v1335_v63  ;;  %v1736_v63 = vld [vmem:[#allocation13] sm:$0xff]  ;;  %v1737_v2 = vld [vmem:[#allocation13 + $0x8] sm:$0xff] }
 0x3d5   : > { %3185 = vmatprep.mubr.msk.f32.mxu1 %vm4264_vm0, %v4265_v1  ;;  %v3707_v4 = vpack.c.bf16 %v1737_v2, %v1736_v63 }
 0x3d6   : > { %v1336_v5 = vmax.f32 %v1259_v3, 0.0  ;;  %v1738_v3 = vld [vmem:[#allocation13 + $0x10] sm:$0xff] }
 0x3d7   : > { %v1263_v6 = vpop.f32.mrb[48].mxu0  ;;  %3708 = vmatpush3.bf16.msra.mxu1 %v3707_v4 }
 0x3d8   : > { %v1264_v7 = vadd.f32 %v4934_v48, %v1263_v6  ;;  %v3101_v9 = vpop.f32.mrb[49].mxu0  ;;  %3186 = vmatmul.mubr.f32.gmra.mrb[46].mxu1 %v1336_v5  ;;  %v1739_v5 = vld [vmem:[#allocation13 + $0x18] sm:$0xff]  ;;  %3709 = vmatprep.subr.bf16.mxu1 %v4263_v0 }
 0x3d9   : > { %3188 = vmatprep.mubr.msk.f32.mxu1 %vm4264_vm0, %v4265_v1  ;;  %v3710_v6 = vpack.c.bf16 %v1739_v5, %v1738_v3 }
 0x3da   : > { %v1337_v10 = vmax.f32 %v1264_v7, 0.0  ;;  %v1741_v7 = vld [vmem:[#allocation13 + $0x28] sm:$0xff] }
 0x3db   : > { %v1268_v11 = vpop.f32.mrb[50].mxu0  ;;  %3711 = vmatpush3.bf16.msra.mxu1 %v3710_v6 }
 0x3dc   : > { %v1269_v12 = vadd.f32 %v4934_v48, %v1268_v11  ;;  %v3104_v13 = vpop.f32.mrb[51].mxu0  ;;  %3189 = vmatmul.mubr.f32.gmra.mrb[48].mxu1 %v1337_v10  ;;  %3712 = vmatprep.subr.bf16.mxu1 %v4263_v0  ;;  %v1742_v10 = vld [vmem:[#allocation13 + $0x30] sm:$0xff]  ;;  %v1743_v11 = vld [vmem:[#allocation13 + $0x38] sm:$0xff] }
 0x3dd   : > { %3191 = vmatprep.mubr.msk.f32.mxu1 %vm4264_vm0, %v4265_v1  ;;  %v1744_v13 = vld [vmem:[#allocation13 + $0x40] sm:$0xff] }
 0x3de   : > { %v1338_v14 = vmax.f32 %v1269_v12, 0.0  ;;  %v3716_v12 = vpack.c.bf16 %v1743_v11, %v1742_v10 }
 0x3df   : > { %v1273_v15 = vpop.f32.mrb[52].mxu0 }
 0x3e0   : > { %v1274_v16 = vadd.f32 %v4934_v48, %v1273_v15  ;;  %v3107_v17 = vpop.f32.mrb[53].mxu0  ;;  %3192 = vmatmul.mubr.f32.gmra.mrb[50].mxu1 %v1338_v14  ;;  %v1745_v14 = vld [vmem:[#allocation13 + $0x48] sm:$0xff] }
 0x3e1   : > { %3194 = vmatprep.mubr.msk.f32.mxu1 %vm4264_vm0, %v4265_v1  ;;  %v3719_v15 = vpack.c.bf16 %v1745_v14, %v1744_v13  ;;  %v1747_v17 = vld [vmem:[#allocation13 + $0x58] sm:$0xff] }
 0x3e2   : > { %v1339_v18 = vmax.f32 %v1274_v16, 0.0  ;;  %v1746_v16 = vld [vmem:[#allocation13 + $0x50] sm:$0xff] }
 0x3e3   : > { %v1278_v19 = vpop.f32.mrb[54].mxu0 }
 0x3e4   : > { %v1279_v20 = vadd.f32 %v4934_v48, %v1278_v19  ;;  %v3110_v21 = vpop.f32.mrb[55].mxu0  ;;  %3195 = vmatmul.mubr.f32.gmra.mrb[52].mxu1 %v1339_v18  ;;  %v3722_v18 = vpack.c.bf16 %v1747_v17, %v1746_v16  ;;  %v1748_v19 = vld [vmem:[#allocation13 + $0x60] sm:$0xff] }
 0x3e5   : > { %3197 = vmatprep.mubr.msk.f32.mxu1 %vm4264_vm0, %v4265_v1 }
 0x3e6   : > { %v1340_v22 = vmax.f32 %v1279_v20, 0.0  ;;  %v1749_v20 = vld [vmem:[#allocation13 + $0x68] sm:$0xff] }
 0x3e7   : > { %v1283_v23 = vpop.f32.mrb[56].mxu0  ;;  %v3725_v21 = vpack.c.bf16 %v1749_v20, %v1748_v19 }
 0x3e8   : > { %v1284_v24 = vadd.f32 %v4934_v48, %v1283_v23  ;;  %v3113_v25 = vpop.f32.mrb[57].mxu0  ;;  %3198 = vmatmul.mubr.f32.gmra.mrb[54].mxu1 %v1340_v22  ;;  %v1750_v22 = vld [vmem:[#allocation13 + $0x70] sm:$0xff]  ;;  %v1751_v23 = vld [vmem:[#allocation13 + $0x78] sm:$0xff] }
 0x3e9   : > { %3200 = vmatprep.mubr.msk.f32.mxu1 %vm4264_vm0, %v4265_v1  ;;  %v5004_v25 = vld [vmem:[%s5469_s14] ss:$0 sm:$0xff] }
 0x3ea   : > { %v1341_v26 = vmax.f32 %v1284_v24, 0.0  ;;  %v3728_v24 = vpack.c.bf16 %v1751_v23, %v1750_v22  ;;  %v1939_v22 = vld [vmem:[#allocation14 + $0x8] sm:$0xff]  ;;  %v1940_v23 = vld [vmem:[#allocation14 + $0x10] sm:$0xff] }
 0x3eb   : > { %v1288_v27 = vpop.f32.mrb[58].mxu0 }
 0x3ec   : > { %v1289_v28 = vadd.f32 %v4934_v48, %v1288_v27  ;;  %v3116_v29 = vpop.f32.mrb[59].mxu0  ;;  %3201 = vmatmul.mubr.f32.gmra.mrb[56].mxu1 %v1341_v26 }
 0x3ed   : > { %3203 = vmatprep.mubr.msk.f32.mxu1 %vm4264_vm0, %v4265_v1 }
 0x3ee   : > { %v1342_v8 = vmax.f32 %v1289_v28, 0.0 }
 0x3ef   : > { %v1293_v30 = vpop.f32.mrb[60].mxu0 }
 0x3f0   : > { %v1294_v32 = vadd.f32 %v4934_v48, %v1293_v30  ;;  %v3119_v33 = vpop.f32.mrb[61].mxu0  ;;  %3204 = vmatmul.mubr.f32.gmra.mrb[58].mxu1 %v1342_v8 }
 0x3f1   : > { %3206 = vmatprep.mubr.msk.f32.mxu1 %vm4264_vm0, %v4265_v1 }
 0x3f2   : > { %v1343_v34 = vmax.f32 %v1294_v32, 0.0 }
 0x3f3   : > { %v1298_v35 = vpop.f32.mrb[62].mxu0 }
 0x3f4   : > { %v1299_v36 = vadd.f32 %v4934_v48, %v1298_v35  ;;  %v3122_v37 = vpop.f32.mrb[63].mxu0  ;;  %3207 = vmatmul.mubr.f32.gmra.mrb[60].mxu1 %v1343_v34 }
 0x3f5   : > { %3209 = vmatprep.mubr.msk.f32.mxu1 %vm4264_vm0, %v4265_v1 }
 0x3f6   : > { %v1344_v38 = vmax.f32 %v1299_v36, 0.0 }
 0x3f7   : > { %v1303_v39 = vpop.f32.mrb[64].mxu0 }
 0x3f8   : > { %v1304_v40 = vadd.f32 %v4934_v48, %v1303_v39  ;;  %v3125_v41 = vpop.f32.mrb[65].mxu0  ;;  %3210 = vmatmul.mubr.f32.gmra.mrb[62].mxu1 %v1344_v38 }
 0x3f9   : > { %3212 = vmatprep.mubr.msk.f32.mxu1 %vm4264_vm0, %v4265_v1 }
 0x3fa   : > { %v1345_v42 = vmax.f32 %v1304_v40, 0.0 }
 0x3fb   : > { %v1308_v43 = vpop.f32.mrb[66].mxu0 }
 0x3fc   : > { %v1309_v44 = vadd.f32 %v4934_v48, %v1308_v43  ;;  %v3128_v45 = vpop.f32.mrb[67].mxu0  ;;  %3213 = vmatmul.mubr.f32.gmra.mrb[64].mxu1 %v1345_v42 }
 0x3fd   : > { %3215 = vmatprep.mubr.msk.f32.mxu1 %vm4264_vm0, %v4265_v1 }
 0x3fe   : > { %v1346_v46 = vmax.f32 %v1309_v44, 0.0 }
 0x3ff   : > { %v1313_v47 = vpop.f32.mrb[68].mxu0 }
 0x400   : > { %v1314_v49 = vadd.f32 %v4934_v48, %v1313_v47  ;;  %v3131_v50 = vpop.f32.mrb[69].mxu0  ;;  %3216 = vmatmul.mubr.f32.gmra.mrb[66].mxu1 %v1346_v46 }
 0x401   : > { %3218 = vmatprep.mubr.msk.f32.mxu1 %vm4264_vm0, %v4265_v1 }
 0x402   : > { %v1347_v51 = vmax.f32 %v1314_v49, 0.0 }
 0x403   : > { %v1318_v52 = vpop.f32.mrb[70].mxu0 }
 0x404   : > { %v1319_v31 = vadd.f32 %v4934_v48, %v1318_v52  ;;  %v3134_v53 = vpop.f32.mrb[71].mxu0  ;;  %3219 = vmatmul.mubr.f32.gmra.mrb[68].mxu1 %v1347_v51 }
 0x405   : > { %3221 = vmatprep.mubr.msk.f32.mxu1 %vm4264_vm0, %v4265_v1 }
 0x406   : > { %v1348_v54 = vmax.f32 %v1319_v31, 0.0 }
 0x407   : > { %v1323_v55 = vpop.f32.mrb[72].mxu0 }
 0x408   : > { %v1324_v56 = vadd.f32 %v4934_v48, %v1323_v55  ;;  %v3137_v57 = vpop.f32.mrb[73].mxu0  ;;  %3222 = vmatmul.mubr.f32.gmra.mrb[70].mxu1 %v1348_v54 }
 0x409   : > { %3224 = vmatprep.mubr.msk.f32.mxu1 %vm4264_vm0, %v4265_v1 }
 0x40a   : > { %v1349_v58 = vmax.f32 %v1324_v56, 0.0 }
 0x40b   : > { %v1328_v59 = vpop.f32.mrb[74].mxu0 }
 0x40c   : > { %v1329_v60 = vadd.f32 %v4934_v48, %v1328_v59  ;;  %v3140_v61 = vpop.f32.mrb[75].mxu0  ;;  %3225 = vmatmul.mubr.f32.gmra.mrb[72].mxu1 %v1349_v58  ;;  %v1740_v48 = vld [vmem:[#allocation13 + $0x20] sm:$0xff] }
 0x40d   : > { %3227 = vmatprep.mubr.msk.f32.mxu1 %vm4264_vm0, %v4265_v1  ;;  %v3713_v9 = vpack.c.bf16 %v1741_v7, %v1740_v48 }
 0x40e   : > { %v1350_v62 = vmax.f32 %v1329_v60, 0.0 }
 0x40f   : > { %3714 = vmatpush3.bf16.msra.mxu1 %v3713_v9 }
 0x410   : > { %3228 = vmatmul.mubr.f32.gmra.mrb[74].mxu1 %v1350_v62  ;;  %3715 = vmatprep.subr.bf16.mxu1 %v4263_v0 }
 0x411   : > { %3351 = vmatprep.mubr.msk.f32.mxu1 %vm4264_vm0, %v4265_v1 }
 0x413   : > { %3717 = vmatpush3.bf16.msra.mxu1 %v3716_v12 }
 0x414   : > { %3718 = vmatprep.subr.bf16.mxu1 %v4263_v0 }
 0x417   : > { %3720 = vmatpush3.bf16.msra.mxu1 %v3719_v15 }
 0x418   : > { %3721 = vmatprep.subr.bf16.mxu1 %v4263_v0 }
 0x41b   : > { %3723 = vmatpush3.bf16.msra.mxu1 %v3722_v18 }
 0x41c   : > { %3724 = vmatprep.subr.bf16.mxu1 %v4263_v0 }
 0x41f   : > { %3726 = vmatpush3.bf16.msra.mxu1 %v3725_v21  ;;  %v1938_v21 = vld [vmem:[#allocation14] sm:$0xff] }
 0x420   : > { %3727 = vmatprep.subr.bf16.mxu1 %v4263_v0 }
 0x423   : > { %3729 = vmatpush3.bf16.msra.mxu1 %v3728_v24  ;;  %v3731_v24 = vpack.c.bf16 %v1939_v22, %v1938_v21 }
 0x424   : > { %3754 = vmatprep.subr.bf16.mxu1 %v4263_v0 }
 0x49b   : > { %v1440_v26 = vpop.f32.mrb[38].mxu1 }
 0x49c   : > { %v1441_v27 = vadd.f32 %v5004_v25, %v1440_v26  ;;  %v3175_v28 = vpop.f32.mrb[39].mxu1  ;;  %v1941_v26 = vld [vmem:[#allocation14 + $0x18] sm:$0xff] }
 0x49d   : > { %v1942_v28 = vld [vmem:[#allocation14 + $0x20] sm:$0xff] }
 0x49e   : > { %2323 = vst [vmem:[%s5009_s10] sm:$0xff] %v1441_v27  ;;  %3263 = vmatmul.mubr.f32.vlgmr.msra.gmra.mrb[76].mxu0 %v1441_v27  ;;  %v3734_v27 = vpack.c.bf16 %v1941_v26, %v1940_v23 }
 0x49f   : > { %v1445_v29 = vpop.f32.mrb[40].mxu1  ;;  %3265 = vmatprep.mubr.msk.f32.mxu0 %vm4264_vm0, %v4265_v1  ;;  %3732 = vmatpush3.bf16.msra.mxu0 %v3731_v24 }
 0x4a0   : > { %v1446_v8 = vadd.f32 %v5004_v25, %v1445_v29  ;;  %v3178_v30 = vpop.f32.mrb[41].mxu1  ;;  %3733 = vmatprep.subr.bf16.mxu0 %v4263_v0  ;;  %v1943_v29 = vld [vmem:[#allocation14 + $0x28] sm:$0xff] }
 0x4a1   : > { %v1945_v30 = vld [vmem:[#allocation14 + $0x38] sm:$0xff] }
 0x4a2   : > { %2324 = vst [vmem:[%s5009_s10 + $0x8] sm:$0xff] %v1446_v8  ;;  %3266 = vmatmul.mubr.f32.gmra.mrb[78].mxu0 %v1446_v8  ;;  %v3737_v8 = vpack.c.bf16 %v1943_v29, %v1942_v28 }
 0x4a3   : > { %v1450_v32 = vpop.f32.mrb[42].mxu1  ;;  %3268 = vmatprep.mubr.msk.f32.mxu0 %vm4264_vm0, %v4265_v1  ;;  %3735 = vmatpush3.bf16.msra.mxu0 %v3734_v27 }
 0x4a4   : > { %v1451_v33 = vadd.f32 %v5004_v25, %v1450_v32  ;;  %v3181_v34 = vpop.f32.mrb[43].mxu1  ;;  %3736 = vmatprep.subr.bf16.mxu0 %v4263_v0 }
 0x4a5   : > { %v1947_v34 = vld [vmem:[#allocation14 + $0x48] sm:$0xff] }
 0x4a6   : > { %2325 = vst [vmem:[%s5009_s10 + $0x10] sm:$0xff] %v1451_v33  ;;  %3269 = vmatmul.mubr.f32.gmra.mrb[80].mxu0 %v1451_v33  ;;  %v1946_v33 = vld [vmem:[#allocation14 + $0x40] sm:$0xff] }
 0x4a7   : > { %v1455_v35 = vpop.f32.mrb[44].mxu1  ;;  %3271 = vmatprep.mubr.msk.f32.mxu0 %vm4264_vm0, %v4265_v1  ;;  %3738 = vmatpush3.bf16.msra.mxu0 %v3737_v8 }
 0x4a8   : > { %v1456_v36 = vadd.f32 %v5004_v25, %v1455_v35  ;;  %v3184_v37 = vpop.f32.mrb[45].mxu1  ;;  %3739 = vmatprep.subr.bf16.mxu0 %v4263_v0  ;;  %v3743_v35 = vpack.c.bf16 %v1947_v34, %v1946_v33 }
 0x4a9   : > { %v1949_v37 = vld [vmem:[#allocation14 + $0x58] sm:$0xff] }
 0x4aa   : > { %2326 = vst [vmem:[%s5009_s10 + $0x18] sm:$0xff] %v1456_v36  ;;  %3272 = vmatmul.mubr.f32.gmra.mrb[82].mxu0 %v1456_v36  ;;  %v1948_v36 = vld [vmem:[#allocation14 + $0x50] sm:$0xff] }
 0x4ab   : > { %v1460_v38 = vpop.f32.mrb[46].mxu1  ;;  %3274 = vmatprep.mubr.msk.f32.mxu0 %vm4264_vm0, %v4265_v1 }
 0x4ac   : > { %v1461_v39 = vadd.f32 %v5004_v25, %v1460_v38  ;;  %v3187_v40 = vpop.f32.mrb[47].mxu1  ;;  %v3746_v38 = vpack.c.bf16 %v1949_v37, %v1948_v36 }
 0x4ad   : > { %v1951_v40 = vld [vmem:[#allocation14 + $0x68] sm:$0xff] }
 0x4ae   : > { %2327 = vst [vmem:[%s5009_s10 + $0x20] sm:$0xff] %v1461_v39  ;;  %3275 = vmatmul.mubr.f32.gmra.mrb[84].mxu0 %v1461_v39  ;;  %v1950_v39 = vld [vmem:[#allocation14 + $0x60] sm:$0xff] }
 0x4af   : > { %v1465_v41 = vpop.f32.mrb[48].mxu1  ;;  %3277 = vmatprep.mubr.msk.f32.mxu0 %vm4264_vm0, %v4265_v1 }
 0x4b0   : > { %v1466_v42 = vadd.f32 %v5004_v25, %v1465_v41  ;;  %v3190_v43 = vpop.f32.mrb[49].mxu1  ;;  %v3749_v41 = vpack.c.bf16 %v1951_v40, %v1950_v39 }
 0x4b1   : > { %v1953_v43 = vld [vmem:[#allocation14 + $0x78] sm:$0xff] }
 0x4b2   : > { %2328 = vst [vmem:[%s5009_s10 + $0x28] sm:$0xff] %v1466_v42  ;;  %3278 = vmatmul.mubr.f32.gmra.mrb[86].mxu0 %v1466_v42  ;;  %v1952_v42 = vld [vmem:[#allocation14 + $0x70] sm:$0xff] }
 0x4b3   : > { %v1470_v44 = vpop.f32.mrb[50].mxu1  ;;  %3280 = vmatprep.mubr.msk.f32.mxu0 %vm4264_vm0, %v4265_v1 }
 0x4b4   : > { %v1471_v45 = vadd.f32 %v5004_v25, %v1470_v44  ;;  %v3193_v46 = vpop.f32.mrb[51].mxu1  ;;  %v3752_v44 = vpack.c.bf16 %v1953_v43, %v1952_v42 }
 0x4b6   : > { %2329 = vst [vmem:[%s5009_s10 + $0x30] sm:$0xff] %v1471_v45  ;;  %3281 = vmatmul.mubr.f32.gmra.mrb[88].mxu0 %v1471_v45  ;;  %v5096_v45 = vld [vmem:[%s5470_s20] ss:$0 sm:$0xff]  ;;  %s2368_s20 = scalar_lea.sflag [#allocation4], %s4676_s22 }
 0x4b7   : > { %v1475_v47 = vpop.f32.mrb[52].mxu1  ;;  %3283 = vmatprep.mubr.msk.f32.mxu0 %vm4264_vm0, %v4265_v1 }
 0x4b8   : > { %v1476_v49 = vadd.f32 %v5004_v25, %v1475_v47  ;;  %v3196_v50 = vpop.f32.mrb[53].mxu1 }
 0x4ba   : > { %2330 = vst [vmem:[%s5009_s10 + $0x38] sm:$0xff] %v1476_v49  ;;  %3284 = vmatmul.mubr.f32.gmra.mrb[90].mxu0 %v1476_v49 }
 0x4bb   : > { %v1480_v51 = vpop.f32.mrb[54].mxu1  ;;  %3286 = vmatprep.mubr.msk.f32.mxu0 %vm4264_vm0, %v4265_v1 }
 0x4bc   : > { %v1481_v52 = vadd.f32 %v5004_v25, %v1480_v51  ;;  %v3199_v31 = vpop.f32.mrb[55].mxu1 }
 0x4be   : > { %2331 = vst [vmem:[%s5009_s10 + $0x40] sm:$0xff] %v1481_v52  ;;  %3287 = vmatmul.mubr.f32.gmra.mrb[92].mxu0 %v1481_v52 }
 0x4bf   : > { %v1485_v53 = vpop.f32.mrb[56].mxu1  ;;  %3289 = vmatprep.mubr.msk.f32.mxu0 %vm4264_vm0, %v4265_v1 }
 0x4c0   : > { %v1486_v54 = vadd.f32 %v5004_v25, %v1485_v53  ;;  %v3202_v55 = vpop.f32.mrb[57].mxu1 }
 0x4c2   : > { %2332 = vst [vmem:[%s5009_s10 + $0x48] sm:$0xff] %v1486_v54  ;;  %3290 = vmatmul.mubr.f32.gmra.mrb[94].mxu0 %v1486_v54 }
 0x4c3   : > { %v1490_v56 = vpop.f32.mrb[58].mxu1  ;;  %3292 = vmatprep.mubr.msk.f32.mxu0 %vm4264_vm0, %v4265_v1 }
 0x4c4   : > { %v1491_v57 = vadd.f32 %v5004_v25, %v1490_v56  ;;  %v3205_v58 = vpop.f32.mrb[59].mxu1 }
 0x4c6   : > { %2333 = vst [vmem:[%s5009_s10 + $0x50] sm:$0xff] %v1491_v57  ;;  %3293 = vmatmul.mubr.f32.gmra.mrb[96].mxu0 %v1491_v57 }
 0x4c7   : > { %v1495_v59 = vpop.f32.mrb[60].mxu1  ;;  %3295 = vmatprep.mubr.msk.f32.mxu0 %vm4264_vm0, %v4265_v1 }
 0x4c8   : > { %v1496_v60 = vadd.f32 %v5004_v25, %v1495_v59  ;;  %v3208_v61 = vpop.f32.mrb[61].mxu1 }
 0x4ca   : > { %2334 = vst [vmem:[%s5009_s10 + $0x58] sm:$0xff] %v1496_v60  ;;  %3296 = vmatmul.mubr.f32.gmra.mrb[98].mxu0 %v1496_v60 }
 0x4cb   : > { %v1500_v62 = vpop.f32.mrb[62].mxu1  ;;  %3298 = vmatprep.mubr.msk.f32.mxu0 %vm4264_vm0, %v4265_v1 }
 0x4cc   : > { %v1501_v63 = vadd.f32 %v5004_v25, %v1500_v62  ;;  %v3211_v2 = vpop.f32.mrb[63].mxu1 }
 0x4ce   : > { %2335 = vst [vmem:[%s5009_s10 + $0x60] sm:$0xff] %v1501_v63  ;;  %3299 = vmatmul.mubr.f32.gmra.mrb[100].mxu0 %v1501_v63 }
 0x4cf   : > { %v1505_v3 = vpop.f32.mrb[64].mxu1  ;;  %3301 = vmatprep.mubr.msk.f32.mxu0 %vm4264_vm0, %v4265_v1 }
 0x4d0   : > { %v1506_v4 = vadd.f32 %v5004_v25, %v1505_v3  ;;  %v3214_v5 = vpop.f32.mrb[65].mxu1 }
 0x4d2   : > { %2336 = vst [vmem:[%s5009_s10 + $0x68] sm:$0xff] %v1506_v4  ;;  %3302 = vmatmul.mubr.f32.gmra.mrb[102].mxu0 %v1506_v4 }
 0x4d3   : > { %v1510_v6 = vpop.f32.mrb[66].mxu1  ;;  %3304 = vmatprep.mubr.msk.f32.mxu0 %vm4264_vm0, %v4265_v1 }
 0x4d4   : > { %v1511_v48 = vadd.f32 %v5004_v25, %v1510_v6  ;;  %v3217_v7 = vpop.f32.mrb[67].mxu1 }
 0x4d6   : > { %2337 = vst [vmem:[%s5009_s10 + $0x70] sm:$0xff] %v1511_v48  ;;  %3305 = vmatmul.mubr.f32.gmra.mrb[104].mxu0 %v1511_v48 }
 0x4d7   : > { %v1515_v9 = vpop.f32.mrb[68].mxu1  ;;  %3307 = vmatprep.mubr.msk.f32.mxu0 %vm4264_vm0, %v4265_v1 }
 0x4d8   : > { %v1516_v10 = vadd.f32 %v5004_v25, %v1515_v9  ;;  %v3220_v11 = vpop.f32.mrb[69].mxu1 }
 0x4da   : > { %2338 = vst [vmem:[%s5009_s10 + $0x78] sm:$0xff] %v1516_v10  ;;  %3308 = vmatmul.mubr.f32.gmra.mrb[106].mxu0 %v1516_v10 }
 0x4db   : > { %v1520_v12 = vpop.f32.mrb[70].mxu1  ;;  %3310 = vmatprep.mubr.msk.f32.mxu0 %vm4264_vm0, %v4265_v1 }
 0x4dc   : > { %v1521_v13 = vadd.f32 %v5004_v25, %v1520_v12  ;;  %v3223_v14 = vpop.f32.mrb[71].mxu1 }
 0x4de   : > { %2339 = vst [vmem:[%s5009_s10 + $0x80] sm:$0xff] %v1521_v13  ;;  %3311 = vmatmul.mubr.f32.gmra.mrb[108].mxu0 %v1521_v13 }
 0x4df   : > { %v1525_v15 = vpop.f32.mrb[72].mxu1  ;;  %3313 = vmatprep.mubr.msk.f32.mxu0 %vm4264_vm0, %v4265_v1 }
 0x4e0   : > { %v1526_v16 = vadd.f32 %v5004_v25, %v1525_v15  ;;  %v3226_v17 = vpop.f32.mrb[73].mxu1 }
 0x4e2   : > { %2340 = vst [vmem:[%s5009_s10 + $0x88] sm:$0xff] %v1526_v16  ;;  %3314 = vmatmul.mubr.f32.gmra.mrb[110].mxu0 %v1526_v16 }
 0x4e3   : > { %v1530_v18 = vpop.f32.mrb[74].mxu1  ;;  %3316 = vmatprep.mubr.msk.f32.mxu0 %vm4264_vm0, %v4265_v1 }
 0x4e4   : > { %v1531_v19 = vadd.f32 %v5004_v25, %v1530_v18  ;;  %v3229_v20 = vpop.f32.mrb[75].mxu1  ;;  %v1944_v25 = vld [vmem:[#allocation14 + $0x30] sm:$0xff] }
 0x4e5   : > { %v3740_v32 = vpack.c.bf16 %v1945_v30, %v1944_v25 }
 0x4e6   : > { %2341 = vst [vmem:[%s5009_s10 + $0x90] sm:$0xff] %v1531_v19  ;;  %3317 = vmatmul.mubr.f32.gmra.mrb[112].mxu0 %v1531_v19 }
 0x4e7   : > { %3440 = vmatprep.mubr.msk.f32.mxu0 %vm4264_vm0, %v4265_v1  ;;  %3741 = vmatpush3.bf16.msra.mxu0 %v3740_v32 }
 0x4e8   : > { %3742 = vmatprep.subr.bf16.mxu0 %v4263_v0 }
 0x4eb   : > { %3744 = vmatpush3.bf16.msra.mxu0 %v3743_v35 }
 0x4ec   : > { %3745 = vmatprep.subr.bf16.mxu0 %v4263_v0 }
 0x4ef   : > { %3747 = vmatpush3.bf16.msra.mxu0 %v3746_v38 }
 0x4f0   : > { %3748 = vmatprep.subr.bf16.mxu0 %v4263_v0 }
 0x4f3   : > { %3750 = vmatpush3.bf16.msra.mxu0 %v3749_v41 }
 0x4f4   : > { %3751 = vmatprep.subr.bf16.mxu0 %v4263_v0 }
 0x4f7   : > { %3753 = vmatpush3.bf16.msra.mxu0 %v3752_v44 }
 0x571   : > { %v1623_v46 = vpop.f32.mrb[76].mxu0 }
 0x572   : > { %v1624_v47 = vadd.f32 %v5096_v45, %v1623_v46  ;;  %v3264_v49 = vpop.f32.mrb[77].mxu0 }
 0x574   : > { %v1717_v50 = vmax.f32 %v1624_v47, 0.0 }
 0x575   : > { %v1628_v51 = vpop.f32.mrb[78].mxu0 }
 0x576   : > { %v1629_v52 = vadd.f32 %v5096_v45, %v1628_v51  ;;  %v3267_v31 = vpop.f32.mrb[79].mxu0  ;;  %3352 = vmatmul.mubr.f32.vlgmr.msra.gmra.mrb[76].mxu1 %v1717_v50 }
 0x577   : > { %3354 = vmatprep.mubr.msk.f32.mxu1 %vm4264_vm0, %v4265_v1 }
 0x578   : > { %v1718_v53 = vmax.f32 %v1629_v52, 0.0 }
 0x579   : > { %v1633_v54 = vpop.f32.mrb[80].mxu0 }
 0x57a   : > { %v1634_v55 = vadd.f32 %v5096_v45, %v1633_v54  ;;  %v3270_v56 = vpop.f32.mrb[81].mxu0  ;;  %3355 = vmatmul.mubr.f32.gmra.mrb[78].mxu1 %v1718_v53 }
 0x57b   : > { %3357 = vmatprep.mubr.msk.f32.mxu1 %vm4264_vm0, %v4265_v1 }
 0x57c   : > { %v1719_v57 = vmax.f32 %v1634_v55, 0.0 }
 0x57d   : > { %v1638_v58 = vpop.f32.mrb[82].mxu0 }
 0x57e   : > { %v1639_v59 = vadd.f32 %v5096_v45, %v1638_v58  ;;  %v3273_v60 = vpop.f32.mrb[83].mxu0  ;;  %3358 = vmatmul.mubr.f32.gmra.mrb[80].mxu1 %v1719_v57 }
 0x57f   : > { %3360 = vmatprep.mubr.msk.f32.mxu1 %vm4264_vm0, %v4265_v1 }
 0x580   : > { %v1720_v61 = vmax.f32 %v1639_v59, 0.0 }
 0x581   : > { %v1643_v62 = vpop.f32.mrb[84].mxu0 }
 0x582   : > { %v1644_v63 = vadd.f32 %v5096_v45, %v1643_v62  ;;  %v3276_v2 = vpop.f32.mrb[85].mxu0  ;;  %3361 = vmatmul.mubr.f32.gmra.mrb[82].mxu1 %v1720_v61  ;;  %v2140_v61 = vld [vmem:[#allocation16] sm:$0xff]  ;;  %v2141_v62 = vld [vmem:[#allocation16 + $0x8] sm:$0xff] }
 0x583   : > { %3363 = vmatprep.mubr.msk.f32.mxu1 %vm4264_vm0, %v4265_v1  ;;  %v3755_v2 = vpack.c.bf16 %v2141_v62, %v2140_v61 }
 0x584   : > { %v1721_v3 = vmax.f32 %v1644_v63, 0.0  ;;  %v2142_v63 = vld [vmem:[#allocation16 + $0x10] sm:$0xff] }
 0x585   : > { %v1648_v4 = vpop.f32.mrb[86].mxu0  ;;  %3756 = vmatpush3.bf16.msra.mxu1 %v3755_v2 }
 0x586   : > { %v1649_v5 = vadd.f32 %v5096_v45, %v1648_v4  ;;  %v3279_v6 = vpop.f32.mrb[87].mxu0  ;;  %3364 = vmatmul.mubr.f32.gmra.mrb[84].mxu1 %v1721_v3  ;;  %v2143_v3 = vld [vmem:[#allocation16 + $0x18] sm:$0xff]  ;;  %3757 = vmatprep.subr.bf16.mxu1 %v4263_v0 }
 0x587   : > { %3366 = vmatprep.mubr.msk.f32.mxu1 %vm4264_vm0, %v4265_v1  ;;  %v3758_v4 = vpack.c.bf16 %v2143_v3, %v2142_v63 }
 0x588   : > { %v1722_v48 = vmax.f32 %v1649_v5, 0.0  ;;  %v2145_v5 = vld [vmem:[#allocation16 + $0x28] sm:$0xff] }
 0x589   : > { %v1653_v7 = vpop.f32.mrb[88].mxu0  ;;  %3759 = vmatpush3.bf16.msra.mxu1 %v3758_v4 }
 0x58a   : > { %v1654_v9 = vadd.f32 %v5096_v45, %v1653_v7  ;;  %v3282_v10 = vpop.f32.mrb[89].mxu0  ;;  %3367 = vmatmul.mubr.f32.gmra.mrb[86].mxu1 %v1722_v48  ;;  %3760 = vmatprep.subr.bf16.mxu1 %v4263_v0  ;;  %v2146_v48 = vld [vmem:[#allocation16 + $0x30] sm:$0xff]  ;;  %v2147_v7 = vld [vmem:[#allocation16 + $0x38] sm:$0xff] }
 0x58b   : > { %3369 = vmatprep.mubr.msk.f32.mxu1 %vm4264_vm0, %v4265_v1  ;;  %v2148_v10 = vld [vmem:[#allocation16 + $0x40] sm:$0xff] }
 0x58c   : > { %v1723_v11 = vmax.f32 %v1654_v9, 0.0  ;;  %v3764_v9 = vpack.c.bf16 %v2147_v7, %v2146_v48 }
 0x58d   : > { %v1658_v12 = vpop.f32.mrb[90].mxu0 }
 0x58e   : > { %v1659_v13 = vadd.f32 %v5096_v45, %v1658_v12  ;;  %v3285_v14 = vpop.f32.mrb[91].mxu0  ;;  %3370 = vmatmul.mubr.f32.gmra.mrb[88].mxu1 %v1723_v11  ;;  %v2149_v11 = vld [vmem:[#allocation16 + $0x48] sm:$0xff] }
 0x58f   : > { %3372 = vmatprep.mubr.msk.f32.mxu1 %vm4264_vm0, %v4265_v1  ;;  %v3767_v12 = vpack.c.bf16 %v2149_v11, %v2148_v10  ;;  %v2151_v14 = vld [vmem:[#allocation16 + $0x58] sm:$0xff] }
 0x590   : > { %v1724_v15 = vmax.f32 %v1659_v13, 0.0  ;;  %v2150_v13 = vld [vmem:[#allocation16 + $0x50] sm:$0xff] }
 0x591   : > { %v1663_v16 = vpop.f32.mrb[92].mxu0 }
 0x592   : > { %v1664_v17 = vadd.f32 %v5096_v45, %v1663_v16  ;;  %v3288_v18 = vpop.f32.mrb[93].mxu0  ;;  %3373 = vmatmul.mubr.f32.gmra.mrb[90].mxu1 %v1724_v15  ;;  %v3770_v15 = vpack.c.bf16 %v2151_v14, %v2150_v13  ;;  %v2152_v16 = vld [vmem:[#allocation16 + $0x60] sm:$0xff] }
 0x593   : > { %3375 = vmatprep.mubr.msk.f32.mxu1 %vm4264_vm0, %v4265_v1 }
 0x594   : > { %v1725_v19 = vmax.f32 %v1664_v17, 0.0  ;;  %v2153_v17 = vld [vmem:[#allocation16 + $0x68] sm:$0xff] }
 0x595   : > { %v1668_v20 = vpop.f32.mrb[94].mxu0  ;;  %v3773_v18 = vpack.c.bf16 %v2153_v17, %v2152_v16 }
 0x596   : > { %v1669_v21 = vadd.f32 %v5096_v45, %v1668_v20  ;;  %v3291_v22 = vpop.f32.mrb[95].mxu0  ;;  %3376 = vmatmul.mubr.f32.gmra.mrb[92].mxu1 %v1725_v19  ;;  %v2154_v19 = vld [vmem:[#allocation16 + $0x70] sm:$0xff]  ;;  %v2155_v20 = vld [vmem:[#allocation16 + $0x78] sm:$0xff] }
 0x597   : > { %3378 = vmatprep.mubr.msk.f32.mxu1 %vm4264_vm0, %v4265_v1  ;;  %v5165_v22 = vld [vmem:[%s5471_s2] ss:$0 sm:$0xff]  ;;  %s4172_s2 = sshll.u32 %s4266_s25, 4  ;;  %s4173_s2 = int_to_ptr.vmem [resolvable:$false] %s4172_s2 }
 0x598   : > { %v1726_v23 = vmax.f32 %v1669_v21, 0.0  ;;  %v3776_v21 = vpack.c.bf16 %v2155_v20, %v2154_v19  ;;  %s4174_s10 = scalar_lea.vmem %s4173_s2, 4864  ;;  %p4175_p2 = scmp.lt.s32.totalorder %s5289_s3, %s4173_s2 }
 0x599   : > { %v1673_v24 = vpop.f32.mrb[96].mxu0  ;;  %p4176_p8 = scmp.lt.s32.totalorder %s4174_s10, %s4168_s18 }
 0x59a   : > { %v1674_v26 = vadd.f32 %v5096_v45, %v1673_v24  ;;  %v3294_v27 = vpop.f32.mrb[97].mxu0  ;;  %3379 = vmatmul.mubr.f32.gmra.mrb[94].mxu1 %v1726_v23 }
 0x59b   : > { %3381 = vmatprep.mubr.msk.f32.mxu1 %vm4264_vm0, %v4265_v1  ;;  %p4177_p4 = por %p4176_p8, %p4175_p2 }
 0x59c   : > { %v1727_v28 = vmax.f32 %v1674_v26, 0.0 }
 0x59d   : > { %v1678_v29 = vpop.f32.mrb[98].mxu0  ;;  %p4178_p10 = pnand %p4177_p4, %p4171_p0 }
 0x59e   : > { %v1679_v8 = vadd.f32 %v5096_v45, %v1678_v29  ;;  %v3297_v25 = vpop.f32.mrb[99].mxu0  ;;  %3382 = vmatmul.mubr.f32.gmra.mrb[96].mxu1 %v1727_v28 }
 0x59f   : > { %3384 = vmatprep.mubr.msk.f32.mxu1 %vm4264_vm0, %v4265_v1 }
 0x5a0   : > { %v1728_v30 = vmax.f32 %v1679_v8, 0.0 }
 0x5a1   : > { %v1683_v32 = vpop.f32.mrb[100].mxu0 }
 0x5a2   : > { %v1684_v33 = vadd.f32 %v5096_v45, %v1683_v32  ;;  %v3300_v34 = vpop.f32.mrb[101].mxu0  ;;  %3385 = vmatmul.mubr.f32.gmra.mrb[98].mxu1 %v1728_v30 }
 0x5a3   : > { %3387 = vmatprep.mubr.msk.f32.mxu1 %vm4264_vm0, %v4265_v1 }
 0x5a4   : > { %v1729_v35 = vmax.f32 %v1684_v33, 0.0 }
 0x5a5   : > { %v1688_v36 = vpop.f32.mrb[102].mxu0 }
 0x5a6   : > { %v1689_v37 = vadd.f32 %v5096_v45, %v1688_v36  ;;  %v3303_v38 = vpop.f32.mrb[103].mxu0  ;;  %3388 = vmatmul.mubr.f32.gmra.mrb[100].mxu1 %v1729_v35 }
 0x5a7   : > { %3390 = vmatprep.mubr.msk.f32.mxu1 %vm4264_vm0, %v4265_v1 }
 0x5a8   : > { %v1730_v39 = vmax.f32 %v1689_v37, 0.0 }
 0x5a9   : > { %v1693_v40 = vpop.f32.mrb[104].mxu0 }
 0x5aa   : > { %v1694_v41 = vadd.f32 %v5096_v45, %v1693_v40  ;;  %v3306_v42 = vpop.f32.mrb[105].mxu0  ;;  %3391 = vmatmul.mubr.f32.gmra.mrb[102].mxu1 %v1730_v39 }
 0x5ab   : > { %3393 = vmatprep.mubr.msk.f32.mxu1 %vm4264_vm0, %v4265_v1 }
 0x5ac   : > { %v1731_v43 = vmax.f32 %v1694_v41, 0.0 }
 0x5ad   : > { %v1698_v44 = vpop.f32.mrb[106].mxu0 }
 0x5ae   : > { %v1699_v46 = vadd.f32 %v5096_v45, %v1698_v44  ;;  %v3309_v47 = vpop.f32.mrb[107].mxu0  ;;  %3394 = vmatmul.mubr.f32.gmra.mrb[104].mxu1 %v1731_v43 }
 0x5af   : > { %3396 = vmatprep.mubr.msk.f32.mxu1 %vm4264_vm0, %v4265_v1 }
 0x5b0   : > { %v1732_v49 = vmax.f32 %v1699_v46, 0.0 }
 0x5b1   : > { %v1703_v50 = vpop.f32.mrb[108].mxu0 }
 0x5b2   : > { %v1704_v51 = vadd.f32 %v5096_v45, %v1703_v50  ;;  %v3312_v52 = vpop.f32.mrb[109].mxu0  ;;  %3397 = vmatmul.mubr.f32.gmra.mrb[106].mxu1 %v1732_v49 }
 0x5b3   : > { %3399 = vmatprep.mubr.msk.f32.mxu1 %vm4264_vm0, %v4265_v1 }
 0x5b4   : > { %v1733_v31 = vmax.f32 %v1704_v51, 0.0 }
 0x5b5   : > { %v1708_v53 = vpop.f32.mrb[110].mxu0 }
 0x5b6   : > { %v1709_v54 = vadd.f32 %v5096_v45, %v1708_v53  ;;  %v3315_v55 = vpop.f32.mrb[111].mxu0  ;;  %3400 = vmatmul.mubr.f32.gmra.mrb[108].mxu1 %v1733_v31 }
 0x5b7   : > { %3402 = vmatprep.mubr.msk.f32.mxu1 %vm4264_vm0, %v4265_v1 }
 0x5b8   : > { %v1734_v56 = vmax.f32 %v1709_v54, 0.0 }
 0x5b9   : > { %v1713_v57 = vpop.f32.mrb[112].mxu0 }
 0x5ba   : > { %v1714_v58 = vadd.f32 %v5096_v45, %v1713_v57  ;;  %v3318_v59 = vpop.f32.mrb[113].mxu0  ;;  %3403 = vmatmul.mubr.f32.gmra.mrb[110].mxu1 %v1734_v56  ;;  %v2144_v45 = vld [vmem:[#allocation16 + $0x20] sm:$0xff] }
 0x5bb   : > { %3405 = vmatprep.mubr.msk.f32.mxu1 %vm4264_vm0, %v4265_v1  ;;  %v3761_v6 = vpack.c.bf16 %v2145_v5, %v2144_v45 }
 0x5bc   : > { %v1735_v60 = vmax.f32 %v1714_v58, 0.0 }
 0x5bd   : > { %3762 = vmatpush3.bf16.msra.mxu1 %v3761_v6 }
 0x5be   : > { %3406 = vmatmul.mubr.f32.gmra.mrb[112].mxu1 %v1735_v60  ;;  %3763 = vmatprep.subr.bf16.mxu1 %v4263_v0 }
 0x5bf   : > { %3529 = vmatprep.mubr.msk.f32.mxu1 %vm4264_vm0, %v4265_v1 }
 0x5c1   : > { %3765 = vmatpush3.bf16.msra.mxu1 %v3764_v9 }
 0x5c2   : > { %3766 = vmatprep.subr.bf16.mxu1 %v4263_v0 }
 0x5c5   : > { %3768 = vmatpush3.bf16.msra.mxu1 %v3767_v12 }
 0x5c6   : > { %3769 = vmatprep.subr.bf16.mxu1 %v4263_v0 }
 0x5c9   : > { %3771 = vmatpush3.bf16.msra.mxu1 %v3770_v15 }
 0x5ca   : > { %3772 = vmatprep.subr.bf16.mxu1 %v4263_v0 }
 0x5cd   : > { %3774 = vmatpush3.bf16.msra.mxu1 %v3773_v18 }
 0x5ce   : > { %3775 = vmatprep.subr.bf16.mxu1 %v4263_v0 }
 0x5d1   : > { %3777 = vmatpush3.bf16.msra.mxu1 %v3776_v21 }
 0x649   : > { %v1825_v23 = vpop.f32.mrb[76].mxu1 }
 0x64a   : > { %v1826_v24 = vadd.f32 %v5165_v22, %v1825_v23  ;;  %v3353_v26 = vpop.f32.mrb[77].mxu1 }
 0x64c   : > { %v1919_v27 = vmax.f32 %v1826_v24, 0.0 }
 0x64d   : > { %v1830_v28 = vpop.f32.mrb[78].mxu1 }
 0x64e   : > { %v1831_v29 = vadd.f32 %v5165_v22, %v1830_v28  ;;  %v3356_v8 = vpop.f32.mrb[79].mxu1  ;;  %3441 = vmatmul.mubr.f32.vlgmr.msra.gmra.mrb[114].mxu0 %v1919_v27 }
 0x64f   : > { %3443 = vmatprep.mubr.msk.f32.mxu0 %vm4264_vm0, %v4265_v1 }
 0x650   : > { %v1920_v0 = vmax.f32 %v1831_v29, 0.0 }
 0x651   : > { %v1835_v25 = vpop.f32.mrb[80].mxu1 }
 0x652   : > { %v1836_v30 = vadd.f32 %v5165_v22, %v1835_v25  ;;  %v3359_v32 = vpop.f32.mrb[81].mxu1  ;;  %3444 = vmatmul.mubr.f32.gmra.mrb[116].mxu0 %v1920_v0 }
 0x653   : > { %3446 = vmatprep.mubr.msk.f32.mxu0 %vm4264_vm0, %v4265_v1 }
 0x654   : > { %v1921_v33 = vmax.f32 %v1836_v30, 0.0 }
 0x655   : > { %v1840_v34 = vpop.f32.mrb[82].mxu1 }
 0x656   : > { %v1841_v35 = vadd.f32 %v5165_v22, %v1840_v34  ;;  %v3362_v36 = vpop.f32.mrb[83].mxu1  ;;  %3447 = vmatmul.mubr.f32.gmra.mrb[118].mxu0 %v1921_v33 }
 0x657   : > { %3449 = vmatprep.mubr.msk.f32.mxu0 %vm4264_vm0, %v4265_v1  ;;  %v5225_v36 = vld [vmem:[%s5472_s16] ss:$0 sm:$0xff] }
 0x658   : > { %v1922_v37 = vmax.f32 %v1841_v35, 0.0 }
 0x659   : > { %v1845_v38 = vpop.f32.mrb[84].mxu1 }
 0x65a   : > { %v1846_v39 = vadd.f32 %v5165_v22, %v1845_v38  ;;  %v3365_v40 = vpop.f32.mrb[85].mxu1  ;;  %3450 = vmatmul.mubr.f32.gmra.mrb[120].mxu0 %v1922_v37 }
 0x65b   : > { %3452 = vmatprep.mubr.msk.f32.mxu0 %vm4264_vm0, %v4265_v1 }
 0x65c   : > { %v1923_v41 = vmax.f32 %v1846_v39, 0.0 }
 0x65d   : > { %v1850_v42 = vpop.f32.mrb[86].mxu1 }
 0x65e   : > { %v1851_v43 = vadd.f32 %v5165_v22, %v1850_v42  ;;  %v3368_v44 = vpop.f32.mrb[87].mxu1  ;;  %3453 = vmatmul.mubr.f32.gmra.mrb[122].mxu0 %v1923_v41 }
 0x65f   : > { %3455 = vmatprep.mubr.msk.f32.mxu0 %vm4264_vm0, %v4265_v1 }
 0x660   : > { %v1924_v46 = vmax.f32 %v1851_v43, 0.0 }
 0x661   : > { %v1855_v47 = vpop.f32.mrb[88].mxu1 }
 0x662   : > { %v1856_v49 = vadd.f32 %v5165_v22, %v1855_v47  ;;  %v3371_v50 = vpop.f32.mrb[89].mxu1  ;;  %3456 = vmatmul.mubr.f32.gmra.mrb[124].mxu0 %v1924_v46 }
 0x663   : > { %3458 = vmatprep.mubr.msk.f32.mxu0 %vm4264_vm0, %v4265_v1 }
 0x664   : > { %v1925_v51 = vmax.f32 %v1856_v49, 0.0 }
 0x665   : > { %v1860_v52 = vpop.f32.mrb[90].mxu1 }
 0x666   : > { %v1861_v31 = vadd.f32 %v5165_v22, %v1860_v52  ;;  %v3374_v53 = vpop.f32.mrb[91].mxu1  ;;  %3459 = vmatmul.mubr.f32.gmra.mrb[126].mxu0 %v1925_v51 }
 0x667   : > { %3461 = vmatprep.mubr.msk.f32.mxu0 %vm4264_vm0, %v4265_v1 }
 0x668   : > { %v1926_v54 = vmax.f32 %v1861_v31, 0.0 }
 0x669   : > { %v1865_v55 = vpop.f32.mrb[92].mxu1 }
 0x66a   : > { %v1866_v56 = vadd.f32 %v5165_v22, %v1865_v55  ;;  %v3377_v57 = vpop.f32.mrb[93].mxu1  ;;  %3462 = vmatmul.mubr.f32.gmra.mrb[128].mxu0 %v1926_v54 }
 0x66b   : > { %3464 = vmatprep.mubr.msk.f32.mxu0 %vm4264_vm0, %v4265_v1 }
 0x66c   : > { %v1927_v58 = vmax.f32 %v1866_v56, 0.0 }
 0x66d   : > { %v1870_v59 = vpop.f32.mrb[94].mxu1 }
 0x66e   : > { %v1871_v60 = vadd.f32 %v5165_v22, %v1870_v59  ;;  %v3380_v61 = vpop.f32.mrb[95].mxu1  ;;  %3465 = vmatmul.mubr.f32.gmra.mrb[130].mxu0 %v1927_v58 }
 0x66f   : > { %3467 = vmatprep.mubr.msk.f32.mxu0 %vm4264_vm0, %v4265_v1 }
 0x670   : > { %v1928_v62 = vmax.f32 %v1871_v60, 0.0 }
 0x671   : > { %v1875_v63 = vpop.f32.mrb[96].mxu1 }
 0x672   : > { %v1876_v2 = vadd.f32 %v5165_v22, %v1875_v63  ;;  %v3383_v3 = vpop.f32.mrb[97].mxu1  ;;  %3468 = vmatmul.mubr.f32.gmra.mrb[132].mxu0 %v1928_v62 }
 0x673   : > { %3470 = vmatprep.mubr.msk.f32.mxu0 %vm4264_vm0, %v4265_v1 }
 0x674   : > { %v1929_v4 = vmax.f32 %v1876_v2, 0.0 }
 0x675   : > { %v1880_v45 = vpop.f32.mrb[98].mxu1 }
 0x676   : > { %v1881_v5 = vadd.f32 %v5165_v22, %v1880_v45  ;;  %v3386_v6 = vpop.f32.mrb[99].mxu1  ;;  %3471 = vmatmul.mubr.f32.gmra.mrb[134].mxu0 %v1929_v4 }
 0x677   : > { %3473 = vmatprep.mubr.msk.f32.mxu0 %vm4264_vm0, %v4265_v1 }
 0x678   : > { %v1930_v48 = vmax.f32 %v1881_v5, 0.0 }
 0x679   : > { %v1885_v7 = vpop.f32.mrb[100].mxu1 }
 0x67a   : > { %v1886_v9 = vadd.f32 %v5165_v22, %v1885_v7  ;;  %v3389_v10 = vpop.f32.mrb[101].mxu1  ;;  %3474 = vmatmul.mubr.f32.gmra.mrb[136].mxu0 %v1930_v48 }
 0x67b   : > { %3476 = vmatprep.mubr.msk.f32.mxu0 %vm4264_vm0, %v4265_v1 }
 0x67c   : > { %v1931_v11 = vmax.f32 %v1886_v9, 0.0 }
 0x67d   : > { %v1890_v12 = vpop.f32.mrb[102].mxu1 }
 0x67e   : > { %v1891_v13 = vadd.f32 %v5165_v22, %v1890_v12  ;;  %v3392_v14 = vpop.f32.mrb[103].mxu1  ;;  %3477 = vmatmul.mubr.f32.gmra.mrb[138].mxu0 %v1931_v11 }
 0x67f   : > { %3479 = vmatprep.mubr.msk.f32.mxu0 %vm4264_vm0, %v4265_v1 }
 0x680   : > { %v1932_v15 = vmax.f32 %v1891_v13, 0.0 }
 0x681   : > { %v1895_v16 = vpop.f32.mrb[104].mxu1 }
 0x682   : > { %v1896_v17 = vadd.f32 %v5165_v22, %v1895_v16  ;;  %v3395_v18 = vpop.f32.mrb[105].mxu1  ;;  %3480 = vmatmul.mubr.f32.gmra.mrb[140].mxu0 %v1932_v15 }
 0x683   : > { %3482 = vmatprep.mubr.msk.f32.mxu0 %vm4264_vm0, %v4265_v1 }
 0x684   : > { %v1933_v19 = vmax.f32 %v1896_v17, 0.0 }
 0x685   : > { %v1900_v20 = vpop.f32.mrb[106].mxu1 }
 0x686   : > { %v1901_v21 = vadd.f32 %v5165_v22, %v1900_v20  ;;  %v3398_v23 = vpop.f32.mrb[107].mxu1  ;;  %3483 = vmatmul.mubr.f32.gmra.mrb[142].mxu0 %v1933_v19 }
 0x687   : > { %3485 = vmatprep.mubr.msk.f32.mxu0 %vm4264_vm0, %v4265_v1 }
 0x688   : > { %v1934_v24 = vmax.f32 %v1901_v21, 0.0 }
 0x689   : > { %v1905_v26 = vpop.f32.mrb[108].mxu1 }
 0x68a   : > { %v1906_v27 = vadd.f32 %v5165_v22, %v1905_v26  ;;  %v3401_v28 = vpop.f32.mrb[109].mxu1  ;;  %3486 = vmatmul.mubr.f32.gmra.mrb[144].mxu0 %v1934_v24 }
 0x68b   : > { %3488 = vmatprep.mubr.msk.f32.mxu0 %vm4264_vm0, %v4265_v1 }
 0x68c   : > { %v1935_v29 = vmax.f32 %v1906_v27, 0.0 }
 0x68d   : > { %v1910_v8 = vpop.f32.mrb[110].mxu1 }
 0x68e   : > { %v1911_v0 = vadd.f32 %v5165_v22, %v1910_v8  ;;  %v3404_v25 = vpop.f32.mrb[111].mxu1  ;;  %3489 = vmatmul.mubr.f32.gmra.mrb[146].mxu0 %v1935_v29 }
 0x68f   : > { %3491 = vmatprep.mubr.msk.f32.mxu0 %vm4264_vm0, %v4265_v1 }
 0x690   : > { %v1936_v30 = vmax.f32 %v1911_v0, 0.0 }
 0x691   : > { %v1915_v32 = vpop.f32.mrb[112].mxu1 }
 0x692   : > { %v1916_v33 = vadd.f32 %v5165_v22, %v1915_v32  ;;  %v3407_v34 = vpop.f32.mrb[113].mxu1  ;;  %3492 = vmatmul.mubr.f32.gmra.mrb[148].mxu0 %v1936_v30 }
 0x693   : > { %3494 = vmatprep.mubr.msk.f32.mxu0 %vm4264_vm0, %v4265_v1 }
 0x694   : > { %v1937_v35 = vmax.f32 %v1916_v33, 0.0 }
 0x696   : > { %3495 = vmatmul.mubr.f32.gmra.mrb[150].mxu0 %v1937_v35 }
 0x721   : > { %v2027_v37 = vpop.f32.mrb[114].mxu0 }
 0x722   : > { %v2028_v38 = vadd.f32 %v5225_v36, %v2027_v37  ;;  %v3442_v39 = vpop.f32.mrb[115].mxu0 }
 0x724   : > { %v2121_v40 = vmax.f32 %v2028_v38, 0.0 }
 0x725   : > { %v2032_v41 = vpop.f32.mrb[116].mxu0 }
 0x726   : > { %v2033_v22 = vadd.f32 %v5225_v36, %v2032_v41  ;;  %v3445_v42 = vpop.f32.mrb[117].mxu0  ;;  %3530 = vmatmul.mubr.f32.vlgmr.msra.gmra.mrb[114].mxu1 %v2121_v40 }
 0x727   : > { %3532 = vmatprep.mubr.msk.f32.mxu1 %vm4264_vm0, %v4265_v1 }
 0x728   : > { %v2122_v43 = vmax.f32 %v2033_v22, 0.0 }
 0x729   : > { %v2037_v44 = vpop.f32.mrb[118].mxu0 }
 0x72a   : > { %v2038_v46 = vadd.f32 %v5225_v36, %v2037_v44  ;;  %v3448_v47 = vpop.f32.mrb[119].mxu0  ;;  %3533 = vmatmul.mubr.f32.gmra.mrb[116].mxu1 %v2122_v43 }
 0x72b   : > { %3535 = vmatprep.mubr.msk.f32.mxu1 %vm4264_vm0, %v4265_v1 }
 0x72c   : > { %v2123_v49 = vmax.f32 %v2038_v46, 0.0 }
 0x72d   : > { %v2042_v50 = vpop.f32.mrb[120].mxu0 }
 0x72e   : > { %v2043_v51 = vadd.f32 %v5225_v36, %v2042_v50  ;;  %v3451_v52 = vpop.f32.mrb[121].mxu0  ;;  %3536 = vmatmul.mubr.f32.gmra.mrb[118].mxu1 %v2123_v49 }
 0x72f   : > { %3538 = vmatprep.mubr.msk.f32.mxu1 %vm4264_vm0, %v4265_v1 }
 0x730   : > { %v2124_v31 = vmax.f32 %v2043_v51, 0.0 }
 0x731   : > { %v2047_v53 = vpop.f32.mrb[122].mxu0 }
 0x732   : > { %v2048_v54 = vadd.f32 %v5225_v36, %v2047_v53  ;;  %v3454_v55 = vpop.f32.mrb[123].mxu0  ;;  %3539 = vmatmul.mubr.f32.gmra.mrb[120].mxu1 %v2124_v31 }
 0x733   : > { %3541 = vmatprep.mubr.msk.f32.mxu1 %vm4264_vm0, %v4265_v1 }
 0x734   : > { %v2125_v56 = vmax.f32 %v2048_v54, 0.0 }
 0x735   : > { %v2052_v57 = vpop.f32.mrb[124].mxu0 }
 0x736   : > { %v2053_v58 = vadd.f32 %v5225_v36, %v2052_v57  ;;  %v3457_v59 = vpop.f32.mrb[125].mxu0  ;;  %3542 = vmatmul.mubr.f32.gmra.mrb[122].mxu1 %v2125_v56 }
 0x737   : > { %3544 = vmatprep.mubr.msk.f32.mxu1 %vm4264_vm0, %v4265_v1 }
 0x738   : > { %v2126_v60 = vmax.f32 %v2053_v58, 0.0 }
 0x739   : > { %v2057_v61 = vpop.f32.mrb[126].mxu0 }
 0x73a   : > { %v2058_v62 = vadd.f32 %v5225_v36, %v2057_v61  ;;  %v3460_v63 = vpop.f32.mrb[127].mxu0  ;;  %3545 = vmatmul.mubr.f32.gmra.mrb[124].mxu1 %v2126_v60 }
 0x73b   : > { %3547 = vmatprep.mubr.msk.f32.mxu1 %vm4264_vm0, %v4265_v1 }
 0x73c   : > { %v2127_v2 = vmax.f32 %v2058_v62, 0.0 }
 0x73d   : > { %v2062_v3 = vpop.f32.mrb[128].mxu0 }
 0x73e   : > { %v2063_v4 = vadd.f32 %v5225_v36, %v2062_v3  ;;  %v3463_v45 = vpop.f32.mrb[129].mxu0  ;;  %3548 = vmatmul.mubr.f32.gmra.mrb[126].mxu1 %v2127_v2 }
 0x73f   : > { %3550 = vmatprep.mubr.msk.f32.mxu1 %vm4264_vm0, %v4265_v1 }
 0x740   : > { %v2128_v5 = vmax.f32 %v2063_v4, 0.0 }
 0x741   : > { %v2067_v6 = vpop.f32.mrb[130].mxu0 }
 0x742   : > { %v2068_v48 = vadd.f32 %v5225_v36, %v2067_v6  ;;  %v3466_v7 = vpop.f32.mrb[131].mxu0  ;;  %3551 = vmatmul.mubr.f32.gmra.mrb[128].mxu1 %v2128_v5 }
 0x743   : > { %3553 = vmatprep.mubr.msk.f32.mxu1 %vm4264_vm0, %v4265_v1 }
 0x744   : > { %v2129_v9 = vmax.f32 %v2068_v48, 0.0 }
 0x745   : > { %v2072_v10 = vpop.f32.mrb[132].mxu0 }
 0x746   : > { %v2073_v11 = vadd.f32 %v5225_v36, %v2072_v10  ;;  %v3469_v12 = vpop.f32.mrb[133].mxu0  ;;  %3554 = vmatmul.mubr.f32.gmra.mrb[130].mxu1 %v2129_v9 }
 0x747   : > { %3556 = vmatprep.mubr.msk.f32.mxu1 %vm4264_vm0, %v4265_v1 }
 0x748   : > { %v2130_v13 = vmax.f32 %v2073_v11, 0.0 }
 0x749   : > { %v2077_v14 = vpop.f32.mrb[134].mxu0 }
 0x74a   : > { %v2078_v15 = vadd.f32 %v5225_v36, %v2077_v14  ;;  %v3472_v16 = vpop.f32.mrb[135].mxu0  ;;  %3557 = vmatmul.mubr.f32.gmra.mrb[132].mxu1 %v2130_v13 }
 0x74b   : > { %3559 = vmatprep.mubr.msk.f32.mxu1 %vm4264_vm0, %v4265_v1 }
 0x74c   : > { %v2131_v17 = vmax.f32 %v2078_v15, 0.0 }
 0x74d   : > { %v2082_v18 = vpop.f32.mrb[136].mxu0 }
 0x74e   : > { %v2083_v19 = vadd.f32 %v5225_v36, %v2082_v18  ;;  %v3475_v20 = vpop.f32.mrb[137].mxu0  ;;  %3560 = vmatmul.mubr.f32.gmra.mrb[134].mxu1 %v2131_v17 }
 0x74f   : > { %3562 = vmatprep.mubr.msk.f32.mxu1 %vm4264_vm0, %v4265_v1 }
 0x750   : > { %v2132_v21 = vmax.f32 %v2083_v19, 0.0 }
 0x751   : > { %v2087_v23 = vpop.f32.mrb[138].mxu0 }
 0x752   : > { %v2088_v24 = vadd.f32 %v5225_v36, %v2087_v23  ;;  %v3478_v26 = vpop.f32.mrb[139].mxu0  ;;  %3563 = vmatmul.mubr.f32.gmra.mrb[136].mxu1 %v2132_v21 }
 0x753   : > { %3565 = vmatprep.mubr.msk.f32.mxu1 %vm4264_vm0, %v4265_v1 }
 0x754   : > { %v2133_v27 = vmax.f32 %v2088_v24, 0.0 }
 0x755   : > { %v2092_v28 = vpop.f32.mrb[140].mxu0 }
 0x756   : > { %v2093_v29 = vadd.f32 %v5225_v36, %v2092_v28  ;;  %v3481_v8 = vpop.f32.mrb[141].mxu0  ;;  %3566 = vmatmul.mubr.f32.gmra.mrb[138].mxu1 %v2133_v27 }
 0x757   : > { %3568 = vmatprep.mubr.msk.f32.mxu1 %vm4264_vm0, %v4265_v1 }
 0x758   : > { %v2134_v0 = vmax.f32 %v2093_v29, 0.0 }
 0x759   : > { %v2097_v25 = vpop.f32.mrb[142].mxu0 }
 0x75a   : > { %v2098_v30 = vadd.f32 %v5225_v36, %v2097_v25  ;;  %v3484_v32 = vpop.f32.mrb[143].mxu0  ;;  %3569 = vmatmul.mubr.f32.gmra.mrb[140].mxu1 %v2134_v0 }
 0x75b   : > { %3571 = vmatprep.mubr.msk.f32.mxu1 %vm4264_vm0, %v4265_v1 }
 0x75c   : > { %v2135_v33 = vmax.f32 %v2098_v30, 0.0 }
 0x75d   : > { %v2102_v34 = vpop.f32.mrb[144].mxu0 }
 0x75e   : > { %v2103_v35 = vadd.f32 %v5225_v36, %v2102_v34  ;;  %v3487_v37 = vpop.f32.mrb[145].mxu0  ;;  %3572 = vmatmul.mubr.f32.gmra.mrb[142].mxu1 %v2135_v33 }
 0x75f   : > { %3574 = vmatprep.mubr.msk.f32.mxu1 %vm4264_vm0, %v4265_v1 }
 0x760   : > { %v2136_v38 = vmax.f32 %v2103_v35, 0.0 }
 0x761   : > { %v2107_v39 = vpop.f32.mrb[146].mxu0 }
 0x762   : > { %v2108_v40 = vadd.f32 %v5225_v36, %v2107_v39  ;;  %v3490_v41 = vpop.f32.mrb[147].mxu0  ;;  %3575 = vmatmul.mubr.f32.gmra.mrb[144].mxu1 %v2136_v38 }
 0x763   : > { %3577 = vmatprep.mubr.msk.f32.mxu1 %vm4264_vm0, %v4265_v1 }
 0x764   : > { %v2137_v22 = vmax.f32 %v2108_v40, 0.0 }
 0x765   : > { %v2112_v42 = vpop.f32.mrb[148].mxu0 }
 0x766   : > { %v2113_v43 = vadd.f32 %v5225_v36, %v2112_v42  ;;  %v3493_v44 = vpop.f32.mrb[149].mxu0  ;;  %3578 = vmatmul.mubr.f32.gmra.mrb[146].mxu1 %v2137_v22 }
 0x767   : > { %3580 = vmatprep.mubr.msk.f32.mxu1 %vm4264_vm0, %v4265_v1 }
 0x768   : > { %v2138_v46 = vmax.f32 %v2113_v43, 0.0 }
 0x769   : > { %v2117_v47 = vpop.f32.mrb[150].mxu0 }
 0x76a   : > { %v2118_v49 = vadd.f32 %v5225_v36, %v2117_v47  ;;  %v3496_v50 = vpop.f32.mrb[151].mxu0  ;;  %3581 = vmatmul.mubr.f32.gmra.mrb[148].mxu1 %v2138_v46 }
 0x76b   : > { %3583 = vmatprep.mubr.msk.f32.mxu1 %vm4264_vm0, %v4265_v1 }
 0x76c   : > { %v2139_v51 = vmax.f32 %v2118_v49, 0.0 }
 0x76e   : > { %3584 = vmatmul.mubr.f32.gmra.mrb[150].mxu1 %v2139_v51 }
 0x76f   : > { %4181 = shalt.err (!%p4178_p10)
}
 0x770   : > { %s4182_s24 = scalar_lea.hbm %s5287_s19, 2432  ;;  %s4186_s17 = scalar_lea.hbm %s5473_s12, 4864 }
 0x771   : > { %p4183_p11 = scmp.ne.s32.totalorder %s5287_s19, %s4182_s24  ;;  %p4187_p7 = scmp.lt.u32.totalorder %s5287_s19, %s5473_s12 }
 0x772   : > { %p4188_p5 = scmp.lt.u32.totalorder %s4186_s17, %s4182_s24  ;;  %p4190_p12 = scmp.lt.u32.totalorder %s4182_s24, %s5287_s19 }
 0x773   : > { %p4184_p3 = pnand %p4183_p11, %p5474_p1 }
 0x774   : > { %p4189_p9 = por %p4188_p5, %p4187_p7 }
 0x775   : > { %p4185_p6 = pneg %p4184_p3 }
 0x776   : > { %p4191_p13 = por %p4190_p12, %p4189_p9 }
 0x778   : > { %p4192_p0 = pnand %p4191_p13, %p4185_p6 }
 0x77a   : > { %4195 = shalt.err (!%p4192_p0)
}
 0x77b   : > { %s4267_s18 = smov 128   ;;  %s4268_s25 = smov 8   ;;  %vm2342_vm1 = vcmask 261120  }
 0x77c   : > { %3814 = dma.vmem_to_hbm [thread:$0]  (%p5474_p1), %s5289_s3, 2432, %s5287_s19, %s2368_s20, %s4267_s18, %s4267_s18, %s4268_s25  }
 0x77d   : > { %s719_s2 = smul.u32 19, %s4385_s1  ;;  %s5475_s24 = sld [smem:[#allocation35_spill]] }
 0x77e   : > { %s5476_s14 = sld [smem:[#allocation36_spill]] }
 0x77f   : > { %p720_p2 = scmp.lt.s32.totalorder %s719_s2, 37 }
 0x781   : > { %s5484_s2 = smov (!%p720_p2, %s719_s2), 37 }
 0x782   : > { %s2580_s10 = sshll.u32 %s5484_s2, 3 }
 0x783   : > { %v5319_v1 = vld [vmem:[%s5475_s24] ss:$0 sm:$0xff] }
 0x784   : > { %s5324_s4 = scalar_lea.vmem %s5476_s14, %s2580_s10 }
 0x7f9   : > { %v2229_v36 = vpop.f32.mrb[114].mxu1 }
 0x7fa   : > { %v2230_v52 = vadd.f32 %v5319_v1, %v2229_v36  ;;  %v3531_v31 = vpop.f32.mrb[115].mxu1 }
 0x7fc   : > { %2343 = vst.msk [vmem:[%s5324_s4] sm:$0xff] %vm2342_vm1, %v2230_v52 }
 0x7fd   : > { %v2234_v53 = vpop.f32.mrb[116].mxu1 }
 0x7fe   : > { %v2235_v54 = vadd.f32 %v5319_v1, %v2234_v53  ;;  %v3534_v55 = vpop.f32.mrb[117].mxu1 }
 0x800   : > { %2344 = vst.msk [vmem:[%s5324_s4 + $0x8] sm:$0xff] %vm2342_vm1, %v2235_v54 }
 0x801   : > { %v2239_v56 = vpop.f32.mrb[118].mxu1 }
 0x802   : > { %v2240_v57 = vadd.f32 %v5319_v1, %v2239_v56  ;;  %v3537_v58 = vpop.f32.mrb[119].mxu1 }
 0x804   : > { %2345 = vst.msk [vmem:[%s5324_s4 + $0x10] sm:$0xff] %vm2342_vm1, %v2240_v57 }
 0x805   : > { %v2244_v59 = vpop.f32.mrb[120].mxu1 }
 0x806   : > { %v2245_v60 = vadd.f32 %v5319_v1, %v2244_v59  ;;  %v3540_v61 = vpop.f32.mrb[121].mxu1 }
 0x808   : > { %2346 = vst.msk [vmem:[%s5324_s4 + $0x18] sm:$0xff] %vm2342_vm1, %v2245_v60 }
 0x809   : > { %v2249_v62 = vpop.f32.mrb[122].mxu1 }
 0x80a   : > { %v2250_v63 = vadd.f32 %v5319_v1, %v2249_v62  ;;  %v3543_v2 = vpop.f32.mrb[123].mxu1 }
 0x80c   : > { %2347 = vst.msk [vmem:[%s5324_s4 + $0x20] sm:$0xff] %vm2342_vm1, %v2250_v63 }
 0x80d   : > { %v2254_v3 = vpop.f32.mrb[124].mxu1 }
 0x80e   : > { %v2255_v4 = vadd.f32 %v5319_v1, %v2254_v3  ;;  %v3546_v45 = vpop.f32.mrb[125].mxu1 }
 0x810   : > { %2348 = vst.msk [vmem:[%s5324_s4 + $0x28] sm:$0xff] %vm2342_vm1, %v2255_v4 }
 0x811   : > { %v2259_v5 = vpop.f32.mrb[126].mxu1 }
 0x812   : > { %v2260_v6 = vadd.f32 %v5319_v1, %v2259_v5  ;;  %v3549_v48 = vpop.f32.mrb[127].mxu1 }
 0x814   : > { %2349 = vst.msk [vmem:[%s5324_s4 + $0x30] sm:$0xff] %vm2342_vm1, %v2260_v6 }
 0x815   : > { %v2264_v7 = vpop.f32.mrb[128].mxu1 }
 0x816   : > { %v2265_v9 = vadd.f32 %v5319_v1, %v2264_v7  ;;  %v3552_v10 = vpop.f32.mrb[129].mxu1 }
 0x818   : > { %2350 = vst.msk [vmem:[%s5324_s4 + $0x38] sm:$0xff] %vm2342_vm1, %v2265_v9 }
 0x819   : > { %v2269_v11 = vpop.f32.mrb[130].mxu1 }
 0x81a   : > { %v2270_v12 = vadd.f32 %v5319_v1, %v2269_v11  ;;  %v3555_v13 = vpop.f32.mrb[131].mxu1 }
 0x81c   : > { %2351 = vst.msk [vmem:[%s5324_s4 + $0x40] sm:$0xff] %vm2342_vm1, %v2270_v12 }
 0x81d   : > { %v2274_v14 = vpop.f32.mrb[132].mxu1 }
 0x81e   : > { %v2275_v15 = vadd.f32 %v5319_v1, %v2274_v14  ;;  %v3558_v16 = vpop.f32.mrb[133].mxu1 }
 0x820   : > { %2352 = vst.msk [vmem:[%s5324_s4 + $0x48] sm:$0xff] %vm2342_vm1, %v2275_v15 }
 0x821   : > { %v2279_v17 = vpop.f32.mrb[134].mxu1 }
 0x822   : > { %v2280_v18 = vadd.f32 %v5319_v1, %v2279_v17  ;;  %v3561_v19 = vpop.f32.mrb[135].mxu1 }
 0x824   : > { %2353 = vst.msk [vmem:[%s5324_s4 + $0x50] sm:$0xff] %vm2342_vm1, %v2280_v18 }
 0x825   : > { %v2284_v20 = vpop.f32.mrb[136].mxu1 }
 0x826   : > { %v2285_v21 = vadd.f32 %v5319_v1, %v2284_v20  ;;  %v3564_v23 = vpop.f32.mrb[137].mxu1 }
 0x828   : > { %2354 = vst.msk [vmem:[%s5324_s4 + $0x58] sm:$0xff] %vm2342_vm1, %v2285_v21 }
 0x829   : > { %v2289_v24 = vpop.f32.mrb[138].mxu1 }
 0x82a   : > { %v2290_v26 = vadd.f32 %v5319_v1, %v2289_v24  ;;  %v3567_v27 = vpop.f32.mrb[139].mxu1 }
 0x82c   : > { %2355 = vst.msk [vmem:[%s5324_s4 + $0x60] sm:$0xff] %vm2342_vm1, %v2290_v26 }
 0x82d   : > { %v2294_v28 = vpop.f32.mrb[140].mxu1 }
 0x82e   : > { %v2295_v29 = vadd.f32 %v5319_v1, %v2294_v28  ;;  %v3570_v8 = vpop.f32.mrb[141].mxu1 }
 0x830   : > { %2356 = vst.msk [vmem:[%s5324_s4 + $0x68] sm:$0xff] %vm2342_vm1, %v2295_v29 }
 0x831   : > { %v2299_v0 = vpop.f32.mrb[142].mxu1 }
 0x832   : > { %v2300_v25 = vadd.f32 %v5319_v1, %v2299_v0  ;;  %v3573_v30 = vpop.f32.mrb[143].mxu1 }
 0x834   : > { %2357 = vst.msk [vmem:[%s5324_s4 + $0x70] sm:$0xff] %vm2342_vm1, %v2300_v25 }
 0x835   : > { %v2304_v32 = vpop.f32.mrb[144].mxu1 }
 0x836   : > { %v2305_v33 = vadd.f32 %v5319_v1, %v2304_v32  ;;  %v3576_v34 = vpop.f32.mrb[145].mxu1 }
 0x838   : > { %2358 = vst.msk [vmem:[%s5324_s4 + $0x78] sm:$0xff] %vm2342_vm1, %v2305_v33 }
 0x839   : > { %v2309_v35 = vpop.f32.mrb[146].mxu1 }
 0x83a   : > { %v2310_v37 = vadd.f32 %v5319_v1, %v2309_v35  ;;  %v3579_v38 = vpop.f32.mrb[147].mxu1 }
 0x83c   : > { %2359 = vst.msk [vmem:[%s5324_s4 + $0x80] sm:$0xff] %vm2342_vm1, %v2310_v37 }
 0x83d   : > { %v2314_v39 = vpop.f32.mrb[148].mxu1 }
 0x83e   : > { %v2315_v40 = vadd.f32 %v5319_v1, %v2314_v39  ;;  %v3582_v41 = vpop.f32.mrb[149].mxu1 }
 0x840   : > { %2360 = vst.msk [vmem:[%s5324_s4 + $0x88] sm:$0xff] %vm2342_vm1, %v2315_v40 }
 0x841   : > { %v2319_v22 = vpop.f32.mrb[150].mxu1 }
 0x842   : > { %v2320_v42 = vadd.f32 %v5319_v1, %v2319_v22  ;;  %v3585_v43 = vpop.f32.mrb[151].mxu1 }
 0x844   : > { %2361 = vst.msk [vmem:[%s5324_s4 + $0x90] sm:$0xff] %vm2342_vm1, %v2320_v42 }
 0x845 PF: > { %s2408_s1 = sand.u32 1, %s4238_s27   ;;  %p5477_p1 = scmp.ne.s32.totalorder %s5452_s23, 0 }
 0x846   : > { %p5478_p8 = scmp.ge.s32.totalorder %s4250_s30, 2  ;;  %s2409_s26 = scalar_lea.sflag [#allocation4], %s2408_s1 }
 0x848   : > { %p3846_p4 = pnand %p5478_p8, %p5477_p1 }
 0x84a   : > { %4233 = dma.done.wait (!%p3846_p4), %s2409_s26, 2432  }
 0x84b   : > { %4235 = vsyncadd (!%p3846_p4), %s2409_s26, 4294964864  ;;  %p36_p10 = scmp.ge.s32.totalorder %s4600_s21, 4   ;;  %s5479_s27 = smov %s4242_s28 }
 0x84c   : > { %s5480_s28 = smov %s4246_s29  ;;  %s5481_s29 = smov %s4611_s8 }
 0x84d   : > { %s5482_s30 = smov %s4600_s21  ;;  %38 = sbr.rel (!%p36_p10) target bundleno = 24 (0x18), region = 177 }
 0x854   :  { %2414 = vsyncpa [#allocation3], 1 }
 0x855   :  { %2416 = vsyncpa [#allocation3 + $0x1], 1 }
 0x856   :  { %2417 = vsyncpa [#allocation6], 1 }
 0x857   :  { %2418 = vsyncpa [#allocation9], 1 }
 0x858   :  { %2419 = vsyncpa [#allocation12], 1 }
 0x859   :  { %2420 = vsyncpa [#allocation15], 1 }
 0x85a   :  { %2421 = vsyncpa [#allocation4], 1 }
 0x85b   :  { %2423 = vsyncpa [#allocation4 + $0x1], 1 }

</bundles_post_ra>
